<compile_context>
chip_gen: v5e
topology: v5e:2x2
jax: 0.10.0
libtpu: 0.0.40
codegen_flags: <defaults>
</compile_context>

<pallas_src>
import functools

import numpy as np
import jax
import jax.numpy as jnp
from jax.experimental import pallas as pl
from jax.experimental.pallas import tpu as pltpu


def _make_row_mats(w_oihw, W):
    """OIHW 3x3 conv weight -> (3, W*Cin, W*Cout) row-matmul matrices.

    M[dy, (w+dx-1)*Cin + c, w*Cout + o] = weight[o, c, dy, dx]  (dx edges dropped)
    so that   out_row[y] = sum_dy  x_rowpad[y+dy] @ M[dy]
    where x_rowpad is the y-zero-padded input with rows flattened as (W*Cin,).
    Built with jnp ops (kron of shifted identities) so it stays jit-traceable.
    """
    wt = jnp.asarray(w_oihw, jnp.float32)      # (Cout, Cin, 3, 3)
    mats = []
    for dy in range(3):
        m = 0.0
        for dx in range(3):
            shift = jnp.eye(W, k=1 - dx, dtype=jnp.float32)   # S[w+dx-1, w] = 1
            m = m + jnp.kron(shift, wt[:, :, dy, dx].T)        # (W*Cin, W*Cout)
        mats.append(m)
    return jnp.stack(mats)                      # (3, W*Cin, W*Cout)


def _leaky_unit_kernel(cat_ref, mrz_ref, mu_ref, mw_ref,
                       fout_ref, r_ref, z_ref, g_ref, *, H, W, Ci, Co):
    WCi = W * Ci
    WCo = W * Co

    def sigmoid(x):
        # exp on the EUP; approx reciprocal also on the EUP -> divide off the VALU.
        return pl.reciprocal(1.0 + jnp.exp(-x), approx=True)

    def conv3(rows, m_ref, n_out):
        acc = jnp.zeros((H, n_out), jnp.float32)
        for dy in range(3):                      # static unroll: 3 MXU pushes
            acc = acc + jnp.dot(rows(dy), m_ref[dy],
                                preferred_element_type=jnp.float32)
        return acc

    # Fused r/z gates: one (H, W*(Ci+Co)) @ (W*(Ci+Co), 2*W*Co) matmul per dy.
    cat_rows = lambda dy: cat_ref[dy:dy + H, :]
    rz = conv3(cat_rows, mrz_ref, 2 * WCo)
    r = sigmoid(rz[:, :WCo])
    z = sigmoid(rz[:, WCo:])

    # g = r * f_n written into a row-padded scratch (full-width, lane-aligned
    # store).  Only the two border rows need zeroing, every grid step.
    zrow = jnp.zeros((1, WCo), g_ref.dtype)
    g_ref[0:1, :] = zrow
    g_ref[H + 1:H + 2, :] = zrow
    fn_in = cat_ref[1:H + 1, WCi:].astype(jnp.float32)
    g_ref[1:H + 1, :] = (r * fn_in).astype(g_ref.dtype)

    fm_rows = lambda dy: cat_ref[dy:dy + H, :WCi]
    g_rows = lambda dy: g_ref[dy:dy + H, :]
    f_hat = jnp.tanh(conv3(fm_rows, mu_ref, WCo) + conv3(g_rows, mw_ref, WCo))

    fm_in = cat_ref[1:H + 1, :WCi].astype(jnp.float32)
    fout_ref[...] = z * fm_in + (1.0 - z) * f_hat
    r_ref[...] = r
    z_ref[...] = z


def leaky_unit_pallas(f_m, f_n, w_r, w, u, w_z, *, compute_dtype=jnp.bfloat16):
    """f_m: (N, Ci, H, W), f_n: (N, Co, H, W) NCHW; weights OIHW, bias-free."""
    N, Ci, H, Wd = f_m.shape
    Co = f_n.shape[1]
    assert Ci == Co, "output blend z*f_m + (1-z)*f_hat requires n_fi == n_fo"
    WCi, WCo = Wd * Ci, Wd * Co
    K = WCi + WCo

    # NHWC, flatten rows to (W*C,), concat [f_m | f_n] along lanes, pad rows.
    fm = jnp.transpose(f_m, (0, 2, 3, 1)).reshape(N, H, WCi)
    fn = jnp.transpose(f_n, (0, 2, 3, 1)).reshape(N, H, WCo)
    cat = jnp.concatenate([fm, fn], axis=-1)                         # (N, H, K)
    cat_rowpad = jnp.pad(cat, ((0, 0), (1, 1), (0, 0))).astype(compute_dtype)

    # Row-matmul weight matrices.  r/z are fused along the output-column axis;
    # their K layout matches the [f_m | f_n] lane layout of `cat_rowpad`.
    mr_m = _make_row_mats(w_r[:, :Ci], Wd)
    mr_n = _make_row_mats(w_r[:, Ci:], Wd)
    mz_m = _make_row_mats(w_z[:, :Ci], Wd)
    mz_n = _make_row_mats(w_z[:, Ci:], Wd)
    m_rz = jnp.concatenate([
        jnp.concatenate([mr_m, mz_m], axis=2),       # f_m rows -> [r | z] cols
        jnp.concatenate([mr_n, mz_n], axis=2),       # f_n rows -> [r | z] cols
    ], axis=1).astype(compute_dtype)                 # (3, K, 2*W*Co)
    m_u = _make_row_mats(u, Wd).astype(compute_dtype)   # (3, W*Ci, W*Co)
    m_w = _make_row_mats(w, Wd).astype(compute_dtype)   # (3, W*Co, W*Co)

    grid_spec = pltpu.PrefetchScalarGridSpec(
        num_scalar_prefetch=0,
        grid=(N,),
        in_specs=[
            # per-image activation block (double-buffered DMA across the grid)
            pl.BlockSpec((pl.Squeezed(), H + 2, K), lambda n: (n, 0, 0)),
            # weight matrices: constant index map -> stay resident in VMEM
            pl.BlockSpec((3, K, 2 * WCo), lambda n: (0, 0, 0)),
            pl.BlockSpec((3, WCi, WCo), lambda n: (0, 0, 0)),
            pl.BlockSpec((3, WCo, WCo), lambda n: (0, 0, 0)),
        ],
        out_specs=(
            pl.BlockSpec((pl.Squeezed(), H, WCo), lambda n: (n, 0, 0)),
            pl.BlockSpec((pl.Squeezed(), H, WCo), lambda n: (n, 0, 0)),
            pl.BlockSpec((pl.Squeezed(), H, WCo), lambda n: (n, 0, 0)),
        ),
        scratch_shapes=[pltpu.VMEM((H + 2, WCo), compute_dtype)],
    )

    out_shape = tuple(jax.ShapeDtypeStruct((N, H, WCo), jnp.float32)
                      for _ in range(3))

    fout_flat, r_flat, z_flat = pl.pallas_call(
        functools.partial(_leaky_unit_kernel, H=H, W=Wd, Ci=Ci, Co=Co),
        out_shape=out_shape,
        grid_spec=grid_spec,
        compiler_params=pltpu.CompilerParams(
            dimension_semantics=("parallel",)),   # megacore batch-split on v7x
    )(cat_rowpad, m_rz, m_u, m_w)

    def unflat(x):  # (N, H, W*Co) -> NCHW
        return jnp.transpose(x.reshape(N, H, Wd, Co), (0, 3, 1, 2))

    return unflat(fout_flat), unflat(r_flat), unflat(z_flat)


def _reference(f_m, f_n, w_r, w, u, w_z):
    conv = lambda x, wt: jax.lax.conv_general_dilated(
        x, wt, (1, 1), 'SAME', dimension_numbers=('NCHW', 'OIHW', 'NCHW'))
    cat = jnp.concatenate([f_m, f_n], axis=1)
    r = jax.nn.sigmoid(conv(cat, w_r))
    f_hat = jnp.tanh(conv(f_m, u) + conv(r * f_n, w))
    z = jax.nn.sigmoid(conv(cat, w_z))
    f_out = z * f_m + (1.0 - z) * f_hat
    return f_out, r, z


if __name__ == "__main__":
    N, Ci, Co, H, W = 2, 8, 8, 16, 16  # n_fi == n_fo (required by the blend)

    key = jax.random.PRNGKey(0)
    k1, k2, k3, k4, k5, k6 = jax.random.split(key, 6)
    f_m = jax.random.normal(k1, (N, Ci, H, W), jnp.float32)
    f_n = jax.random.normal(k2, (N, Co, H, W), jnp.float32)
    # Deterministic synthetic conv weights (Conv2d OIHW, bias=False).
    w_r = 0.1 * jax.random.normal(k3, (Co, Ci + Co, 3, 3), jnp.float32)
    w_  = 0.1 * jax.random.normal(k4, (Co, Co, 3, 3), jnp.float32)
    u_  = 0.1 * jax.random.normal(k5, (Co, Ci, 3, 3), jnp.float32)
    w_z = 0.1 * jax.random.normal(k6, (Co, Ci + Co, 3, 3), jnp.float32)

    out = leaky_unit_pallas(f_m, f_n, w_r, w_, u_, w_z)
    out = jax.block_until_ready(out)

    ref = _reference(f_m, f_n, w_r, w_, u_, w_z)
    for a, b in zip(out, ref):
        np.testing.assert_allclose(np.asarray(a), np.asarray(b),
                                   atol=2e-2, rtol=2e-2)

    print("KERNEL_OK")
</pallas_src>

<mosaic_0001>
module attributes {stable_mosaic.version = 11 : i64} {
  func.func @_leaky_unit_kernel(%arg0: i32, %arg1: memref<1x18x256xbf16, #tpu.memory_space<vmem>>, %arg2: memref<3x256x256xbf16, #tpu.memory_space<vmem>>, %arg3: memref<3x128x128xbf16, #tpu.memory_space<vmem>>, %arg4: memref<3x128x128xbf16, #tpu.memory_space<vmem>>, %arg5: memref<1x16x128xf32, #tpu.memory_space<vmem>>, %arg6: memref<1x16x128xf32, #tpu.memory_space<vmem>>, %arg7: memref<1x16x128xf32, #tpu.memory_space<vmem>>, %arg8: memref<18x128xbf16, #tpu.memory_space<vmem>>) attributes {dimension_semantics = [#tpu.dimension_semantics<parallel>], iteration_bounds = array<i64: 2>, scalar_prefetch = 0 : i64, scratch_operands = 1 : i64, tpu.core_type = #tpu.core_type<tc>, window_params = [{transform_indices = @transform_0, window_bounds = array<i64: 1, 18, 256>}, {pipeline_mode = #tpu.pipeline_mode<synchronous>, transform_indices = @transform_1, window_bounds = array<i64: 3, 256, 256>}, {pipeline_mode = #tpu.pipeline_mode<synchronous>, transform_indices = @transform_2, window_bounds = array<i64: 3, 128, 128>}, {pipeline_mode = #tpu.pipeline_mode<synchronous>, transform_indices = @transform_3, window_bounds = array<i64: 3, 128, 128>}, {transform_indices = @transform_4, window_bounds = array<i64: 1, 16, 128>}, {transform_indices = @transform_5, window_bounds = array<i64: 1, 16, 128>}, {transform_indices = @transform_6, window_bounds = array<i64: 1, 16, 128>}]} {
    %cst = arith.constant 0.000000e+00 : f32
    %0 = vector.broadcast %cst : f32 to vector<16x256xf32>
    %c0 = arith.constant 0 : index
    %c0_0 = arith.constant 0 : index
    %c0_1 = arith.constant 0 : index
    %1 = vector.load %arg1[%c0, %c0_0, %c0_1] : memref<1x18x256xbf16, #tpu.memory_space<vmem>>, vector<1x16x256xbf16>
    %2 = vector.shape_cast %1 : vector<1x16x256xbf16> to vector<16x256xbf16>
    %c0_2 = arith.constant 0 : index
    %c0_3 = arith.constant 0 : index
    %c0_4 = arith.constant 0 : index
    %3 = vector.load %arg2[%c0_2, %c0_3, %c0_4] : memref<3x256x256xbf16, #tpu.memory_space<vmem>>, vector<1x256x256xbf16>
    %4 = vector.shape_cast %3 : vector<1x256x256xbf16> to vector<256x256xbf16>
    %cst_5 = arith.constant dense<0.000000e+00> : vector<16x256xf32>
    %5 = tpu.matmul %2, %4, %cst_5 {dimension_numbers = #tpu.dot_dimension_numbers<[1], [0], [0], [1], [0, 0, 1, 1], [], []>} : vector<16x256xbf16>, vector<256x256xbf16>, vector<16x256xf32> -> vector<16x256xf32>
    %6 = arith.addf %0, %5 : vector<16x256xf32>
    %c0_6 = arith.constant 0 : index
    %c1 = arith.constant 1 : index
    %c0_7 = arith.constant 0 : index
    %7 = vector.load %arg1[%c0_6, %c1, %c0_7] : memref<1x18x256xbf16, #tpu.memory_space<vmem>>, vector<1x16x256xbf16>
    %8 = vector.shape_cast %7 : vector<1x16x256xbf16> to vector<16x256xbf16>
    %c1_8 = arith.constant 1 : index
    %c0_9 = arith.constant 0 : index
    %c0_10 = arith.constant 0 : index
    %9 = vector.load %arg2[%c1_8, %c0_9, %c0_10] : memref<3x256x256xbf16, #tpu.memory_space<vmem>>, vector<1x256x256xbf16>
    %10 = vector.shape_cast %9 : vector<1x256x256xbf16> to vector<256x256xbf16>
    %cst_11 = arith.constant dense<0.000000e+00> : vector<16x256xf32>
    %11 = tpu.matmul %8, %10, %cst_11 {dimension_numbers = #tpu.dot_dimension_numbers<[1], [0], [0], [1], [0, 0, 1, 1], [], []>} : vector<16x256xbf16>, vector<256x256xbf16>, vector<16x256xf32> -> vector<16x256xf32>
    %12 = arith.addf %6, %11 : vector<16x256xf32>
    %c0_12 = arith.constant 0 : index
    %c2 = arith.constant 2 : index
    %c0_13 = arith.constant 0 : index
    %13 = vector.load %arg1[%c0_12, %c2, %c0_13] : memref<1x18x256xbf16, #tpu.memory_space<vmem>>, vector<1x16x256xbf16>
    %14 = vector.shape_cast %13 : vector<1x16x256xbf16> to vector<16x256xbf16>
    %c2_14 = arith.constant 2 : index
    %c0_15 = arith.constant 0 : index
    %c0_16 = arith.constant 0 : index
    %15 = vector.load %arg2[%c2_14, %c0_15, %c0_16] : memref<3x256x256xbf16, #tpu.memory_space<vmem>>, vector<1x256x256xbf16>
    %16 = vector.shape_cast %15 : vector<1x256x256xbf16> to vector<256x256xbf16>
    %cst_17 = arith.constant dense<0.000000e+00> : vector<16x256xf32>
    %17 = tpu.matmul %14, %16, %cst_17 {dimension_numbers = #tpu.dot_dimension_numbers<[1], [0], [0], [1], [0, 0, 1, 1], [], []>} : vector<16x256xbf16>, vector<256x256xbf16>, vector<16x256xf32> -> vector<16x256xf32>
    %18 = arith.addf %12, %17 : vector<16x256xf32>
    %19 = vector.extract_strided_slice %18 {offsets = [0, 0], sizes = [16, 128], strides = [1, 1]} : vector<16x256xf32> to vector<16x128xf32>
    %cst_18 = arith.constant 0.000000e+00 : f32
    %20 = vector.broadcast %cst_18 : f32 to vector<16x128xf32>
    %21 = arith.subf %20, %19 : vector<16x128xf32>
    %22 = math.exp %21 : vector<16x128xf32>
    %cst_19 = arith.constant 1.000000e+00 : f32
    %23 = vector.broadcast %cst_19 : f32 to vector<16x128xf32>
    %24 = arith.addf %23, %22 : vector<16x128xf32>
    %25 = tpu.reciprocal %24 {approx = true} : vector<16x128xf32> -> vector<16x128xf32>
    %26 = vector.extract_strided_slice %18 {offsets = [0, 128], sizes = [16, 128], strides = [1, 1]} : vector<16x256xf32> to vector<16x128xf32>
    %cst_20 = arith.constant 0.000000e+00 : f32
    %27 = vector.broadcast %cst_20 : f32 to vector<16x128xf32>
    %28 = arith.subf %27, %26 : vector<16x128xf32>
    %29 = math.exp %28 : vector<16x128xf32>
    %cst_21 = arith.constant 1.000000e+00 : f32
    %30 = vector.broadcast %cst_21 : f32 to vector<16x128xf32>
    %31 = arith.addf %30, %29 : vector<16x128xf32>
    %32 = tpu.reciprocal %31 {approx = true} : vector<16x128xf32> -> vector<16x128xf32>
    %cst_22 = arith.constant 0.000000e+00 : bf16
    %33 = vector.broadcast %cst_22 : bf16 to vector<1x128xbf16>
    %c0_23 = arith.constant 0 : index
    %c0_24 = arith.constant 0 : index
    %34 = vector.load %arg8[%c0_23, %c0_24] : memref<18x128xbf16, #tpu.memory_space<vmem>>, vector<1x128xbf16>
    tpu.vector_store %arg8[%c0_23, %c0_24], %33 {strides = array<i32>} : memref<18x128xbf16, #tpu.memory_space<vmem>>, vector<1x128xbf16>,
    %c17 = arith.constant 17 : index
    %c0_25 = arith.constant 0 : index
    %35 = vector.load %arg8[%c17, %c0_25] : memref<18x128xbf16, #tpu.memory_space<vmem>>, vector<1x128xbf16>
    tpu.vector_store %arg8[%c17, %c0_25], %33 {strides = array<i32>} : memref<18x128xbf16, #tpu.memory_space<vmem>>, vector<1x128xbf16>,
    %c0_26 = arith.constant 0 : index
    %c1_27 = arith.constant 1 : index
    %c128 = arith.constant 128 : index
    %36 = vector.load %arg1[%c0_26, %c1_27, %c128] : memref<1x18x256xbf16, #tpu.memory_space<vmem>>, vector<1x16x128xbf16>
    %37 = vector.shape_cast %36 : vector<1x16x128xbf16> to vector<16x128xbf16>
    %38 = arith.extf %37 : vector<16x128xbf16> to vector<16x128xf32>
    %39 = arith.mulf %25, %38 : vector<16x128xf32>
    %40 = arith.truncf %39 : vector<16x128xf32> to vector<16x128xbf16>
    %c1_28 = arith.constant 1 : index
    %c0_29 = arith.constant 0 : index
    %41 = vector.load %arg8[%c1_28, %c0_29] : memref<18x128xbf16, #tpu.memory_space<vmem>>, vector<16x128xbf16>
    tpu.vector_store %arg8[%c1_28, %c0_29], %40 {strides = array<i32>} : memref<18x128xbf16, #tpu.memory_space<vmem>>, vector<16x128xbf16>,
    %cst_30 = arith.constant 0.000000e+00 : f32
    %42 = vector.broadcast %cst_30 : f32 to vector<16x128xf32>
    %c0_31 = arith.constant 0 : index
    %c0_32 = arith.constant 0 : index
    %c0_33 = arith.constant 0 : index
    %43 = vector.load %arg1[%c0_31, %c0_32, %c0_33] : memref<1x18x256xbf16, #tpu.memory_space<vmem>>, vector<1x16x128xbf16>
    %44 = vector.shape_cast %43 : vector<1x16x128xbf16> to vector<16x128xbf16>
    %c0_34 = arith.constant 0 : index
    %c0_35 = arith.constant 0 : index
    %c0_36 = arith.constant 0 : index
    %45 = vector.load %arg3[%c0_34, %c0_35, %c0_36] : memref<3x128x128xbf16, #tpu.memory_space<vmem>>, vector<1x128x128xbf16>
    %46 = vector.shape_cast %45 : vector<1x128x128xbf16> to vector<128x128xbf16>
    %cst_37 = arith.constant dense<0.000000e+00> : vector<16x128xf32>
    %47 = tpu.matmul %44, %46, %cst_37 {dimension_numbers = #tpu.dot_dimension_numbers<[1], [0], [0], [1], [0, 0, 1, 1], [], []>} : vector<16x128xbf16>, vector<128x128xbf16>, vector<16x128xf32> -> vector<16x128xf32>
    %48 = arith.addf %42, %47 : vector<16x128xf32>
    %c0_38 = arith.constant 0 : index
    %c1_39 = arith.constant 1 : index
    %c0_40 = arith.constant 0 : index
    %49 = vector.load %arg1[%c0_38, %c1_39, %c0_40] : memref<1x18x256xbf16, #tpu.memory_space<vmem>>, vector<1x16x128xbf16>
    %50 = vector.shape_cast %49 : vector<1x16x128xbf16> to vector<16x128xbf16>
    %c1_41 = arith.constant 1 : index
    %c0_42 = arith.constant 0 : index
    %c0_43 = arith.constant 0 : index
    %51 = vector.load %arg3[%c1_41, %c0_42, %c0_43] : memref<3x128x128xbf16, #tpu.memory_space<vmem>>, vector<1x128x128xbf16>
    %52 = vector.shape_cast %51 : vector<1x128x128xbf16> to vector<128x128xbf16>
    %cst_44 = arith.constant dense<0.000000e+00> : vector<16x128xf32>
    %53 = tpu.matmul %50, %52, %cst_44 {dimension_numbers = #tpu.dot_dimension_numbers<[1], [0], [0], [1], [0, 0, 1, 1], [], []>} : vector<16x128xbf16>, vector<128x128xbf16>, vector<16x128xf32> -> vector<16x128xf32>
    %54 = arith.addf %48, %53 : vector<16x128xf32>
    %c0_45 = arith.constant 0 : index
    %c2_46 = arith.constant 2 : index
    %c0_47 = arith.constant 0 : index
    %55 = vector.load %arg1[%c0_45, %c2_46, %c0_47] : memref<1x18x256xbf16, #tpu.memory_space<vmem>>, vector<1x16x128xbf16>
    %56 = vector.shape_cast %55 : vector<1x16x128xbf16> to vector<16x128xbf16>
    %c2_48 = arith.constant 2 : index
    %c0_49 = arith.constant 0 : index
    %c0_50 = arith.constant 0 : index
    %57 = vector.load %arg3[%c2_48, %c0_49, %c0_50] : memref<3x128x128xbf16, #tpu.memory_space<vmem>>, vector<1x128x128xbf16>
    %58 = vector.shape_cast %57 : vector<1x128x128xbf16> to vector<128x128xbf16>
    %cst_51 = arith.constant dense<0.000000e+00> : vector<16x128xf32>
    %59 = tpu.matmul %56, %58, %cst_51 {dimension_numbers = #tpu.dot_dimension_numbers<[1], [0], [0], [1], [0, 0, 1, 1], [], []>} : vector<16x128xbf16>, vector<128x128xbf16>, vector<16x128xf32> -> vector<16x128xf32>
    %60 = arith.addf %54, %59 : vector<16x128xf32>
    %cst_52 = arith.constant 0.000000e+00 : f32
    %61 = vector.broadcast %cst_52 : f32 to vector<16x128xf32>
    %c0_53 = arith.constant 0 : index
    %c0_54 = arith.constant 0 : index
    %62 = vector.load %arg8[%c0_53, %c0_54] : memref<18x128xbf16, #tpu.memory_space<vmem>>, vector<16x128xbf16>
    %c0_55 = arith.constant 0 : index
    %c0_56 = arith.constant 0 : index
    %c0_57 = arith.constant 0 : index
    %63 = vector.load %arg4[%c0_55, %c0_56, %c0_57] : memref<3x128x128xbf16, #tpu.memory_space<vmem>>, vector<1x128x128xbf16>
    %64 = vector.shape_cast %63 : vector<1x128x128xbf16> to vector<128x128xbf16>
    %cst_58 = arith.constant dense<0.000000e+00> : vector<16x128xf32>
    %65 = tpu.matmul %62, %64, %cst_58 {dimension_numbers = #tpu.dot_dimension_numbers<[1], [0], [0], [1], [0, 0, 1, 1], [], []>} : vector<16x128xbf16>, vector<128x128xbf16>, vector<16x128xf32> -> vector<16x128xf32>
    %66 = arith.addf %61, %65 : vector<16x128xf32>
    %c1_59 = arith.constant 1 : index
    %c0_60 = arith.constant 0 : index
    %67 = vector.load %arg8[%c1_59, %c0_60] : memref<18x128xbf16, #tpu.memory_space<vmem>>, vector<16x128xbf16>
    %c1_61 = arith.constant 1 : index
    %c0_62 = arith.constant 0 : index
    %c0_63 = arith.constant 0 : index
    %68 = vector.load %arg4[%c1_61, %c0_62, %c0_63] : memref<3x128x128xbf16, #tpu.memory_space<vmem>>, vector<1x128x128xbf16>
    %69 = vector.shape_cast %68 : vector<1x128x128xbf16> to vector<128x128xbf16>
    %cst_64 = arith.constant dense<0.000000e+00> : vector<16x128xf32>
    %70 = tpu.matmul %67, %69, %cst_64 {dimension_numbers = #tpu.dot_dimension_numbers<[1], [0], [0], [1], [0, 0, 1, 1], [], []>} : vector<16x128xbf16>, vector<128x128xbf16>, vector<16x128xf32> -> vector<16x128xf32>
    %71 = arith.addf %66, %70 : vector<16x128xf32>
    %c2_65 = arith.constant 2 : index
    %c0_66 = arith.constant 0 : index
    %72 = vector.load %arg8[%c2_65, %c0_66] : memref<18x128xbf16, #tpu.memory_space<vmem>>, vector<16x128xbf16>
    %c2_67 = arith.constant 2 : index
    %c0_68 = arith.constant 0 : index
    %c0_69 = arith.constant 0 : index
    %73 = vector.load %arg4[%c2_67, %c0_68, %c0_69] : memref<3x128x128xbf16, #tpu.memory_space<vmem>>, vector<1x128x128xbf16>
    %74 = vector.shape_cast %73 : vector<1x128x128xbf16> to vector<128x128xbf16>
    %cst_70 = arith.constant dense<0.000000e+00> : vector<16x128xf32>
    %75 = tpu.matmul %72, %74, %cst_70 {dimension_numbers = #tpu.dot_dimension_numbers<[1], [0], [0], [1], [0, 0, 1, 1], [], []>} : vector<16x128xbf16>, vector<128x128xbf16>, vector<16x128xf32> -> vector<16x128xf32>
    %76 = arith.addf %71, %75 : vector<16x128xf32>
    %77 = arith.addf %60, %76 : vector<16x128xf32>
    %78 = math.tanh %77 : vector<16x128xf32>
    %c0_71 = arith.constant 0 : index
    %c1_72 = arith.constant 1 : index
    %c0_73 = arith.constant 0 : index
    %79 = vector.load %arg1[%c0_71, %c1_72, %c0_73] : memref<1x18x256xbf16, #tpu.memory_space<vmem>>, vector<1x16x128xbf16>
    %80 = vector.shape_cast %79 : vector<1x16x128xbf16> to vector<16x128xbf16>
    %81 = arith.extf %80 : vector<16x128xbf16> to vector<16x128xf32>
    %82 = arith.mulf %32, %81 : vector<16x128xf32>
    %cst_74 = arith.constant 1.000000e+00 : f32
    %83 = vector.broadcast %cst_74 : f32 to vector<16x128xf32>
    %84 = arith.subf %83, %32 : vector<16x128xf32>
    %85 = arith.mulf %84, %78 : vector<16x128xf32>
    %86 = arith.addf %82, %85 : vector<16x128xf32>
    %c0_75 = arith.constant 0 : index
    %c0_76 = arith.constant 0 : index
    %c0_77 = arith.constant 0 : index
    %87 = vector.load %arg5[%c0_75, %c0_76, %c0_77] : memref<1x16x128xf32, #tpu.memory_space<vmem>>, vector<1x16x128xf32>
    %88 = vector.shape_cast %87 : vector<1x16x128xf32> to vector<16x128xf32>
    %89 = vector.shape_cast %86 : vector<16x128xf32> to vector<1x16x128xf32>
    tpu.vector_store %arg5[%c0_75, %c0_76, %c0_77], %89 {strides = array<i32>} : memref<1x16x128xf32, #tpu.memory_space<vmem>>, vector<1x16x128xf32>,
    %c0_78 = arith.constant 0 : index
    %c0_79 = arith.constant 0 : index
    %c0_80 = arith.constant 0 : index
    %90 = vector.load %arg6[%c0_78, %c0_79, %c0_80] : memref<1x16x128xf32, #tpu.memory_space<vmem>>, vector<1x16x128xf32>
    %91 = vector.shape_cast %90 : vector<1x16x128xf32> to vector<16x128xf32>
    %92 = vector.shape_cast %25 : vector<16x128xf32> to vector<1x16x128xf32>
    tpu.vector_store %arg6[%c0_78, %c0_79, %c0_80], %92 {strides = array<i32>} : memref<1x16x128xf32, #tpu.memory_space<vmem>>, vector<1x16x128xf32>,
    %c0_81 = arith.constant 0 : index
    %c0_82 = arith.constant 0 : index
    %c0_83 = arith.constant 0 : index
    %93 = vector.load %arg7[%c0_81, %c0_82, %c0_83] : memref<1x16x128xf32, #tpu.memory_space<vmem>>, vector<1x16x128xf32>
    %94 = vector.shape_cast %93 : vector<1x16x128xf32> to vector<16x128xf32>
    %95 = vector.shape_cast %32 : vector<16x128xf32> to vector<1x16x128xf32>
    tpu.vector_store %arg7[%c0_81, %c0_82, %c0_83], %95 {strides = array<i32>} : memref<1x16x128xf32, #tpu.memory_space<vmem>>, vector<1x16x128xf32>,
    return
  }
  func.func @transform_0(%arg0: i32) -> (i32, i32, i32) {
    %c0_i32 = arith.constant 0 : i32
    %c0_i32_0 = arith.constant 0 : i32
    %c0_i32_1 = arith.constant 0 : i32
    return %arg0, %c0_i32, %c0_i32_0 : i32, i32, i32
  }
  func.func @transform_1(%arg0: i32) -> (i32, i32, i32) {
    %c0_i32 = arith.constant 0 : i32
    %c0_i32_0 = arith.constant 0 : i32
    %c0_i32_1 = arith.constant 0 : i32
    %c0_i32_2 = arith.constant 0 : i32
    return %c0_i32, %c0_i32_0, %c0_i32_1 : i32, i32, i32
  }
  func.func @transform_2(%arg0: i32) -> (i32, i32, i32) {
    %c0_i32 = arith.constant 0 : i32
    %c0_i32_0 = arith.constant 0 : i32
    %c0_i32_1 = arith.constant 0 : i32
    %c0_i32_2 = arith.constant 0 : i32
    return %c0_i32, %c0_i32_0, %c0_i32_1 : i32, i32, i32
  }
  func.func @transform_3(%arg0: i32) -> (i32, i32, i32) {
    %c0_i32 = arith.constant 0 : i32
    %c0_i32_0 = arith.constant 0 : i32
    %c0_i32_1 = arith.constant 0 : i32
    %c0_i32_2 = arith.constant 0 : i32
    return %c0_i32, %c0_i32_0, %c0_i32_1 : i32, i32, i32
  }
  func.func @transform_4(%arg0: i32) -> (i32, i32, i32) {
    %c0_i32 = arith.constant 0 : i32
    %c0_i32_0 = arith.constant 0 : i32
    %c0_i32_1 = arith.constant 0 : i32
    return %arg0, %c0_i32, %c0_i32_0 : i32, i32, i32
  }
  func.func @transform_5(%arg0: i32) -> (i32, i32, i32) {
    %c0_i32 = arith.constant 0 : i32
    %c0_i32_0 = arith.constant 0 : i32
    %c0_i32_1 = arith.constant 0 : i32
    return %arg0, %c0_i32, %c0_i32_0 : i32, i32, i32
  }
  func.func @transform_6(%arg0: i32) -> (i32, i32, i32) {
    %c0_i32 = arith.constant 0 : i32
    %c0_i32_0 = arith.constant 0 : i32
    %c0_i32_1 = arith.constant 0 : i32
    return %arg0, %c0_i32, %c0_i32_0 : i32, i32, i32
  }
}

</mosaic_0001>

<bundles_post_ra>
// kernel: tpu_custom_call.1
= control target key start
LH: loop header
LB: loop body
LE: loop exit
PB: predicated region body
PF: predicated region fallthrough
CT: control target
= control target key end

     0   :  { %s3426_s0 = inlined_call_operand.vmem [shape: bf16[2,18,256], index: 0, kind: input, shape index: {}]   ;;  %s3427_s1 = inlined_call_operand.hbm [shape: bf16[3,256,256], index: 1, kind: input, shape index: {}]   ;;  %s3428_s2 = inlined_call_operand.hbm [shape: bf16[3,128,128], index: 2, kind: input, shape index: {}]   ;;  %s3429_s3 = inlined_call_operand.hbm [shape: bf16[3,128,128], index: 3, kind: input, shape index: {}]   ;;  %s3430_s4 = inlined_call_operand.hbm [shape: f32[2,16,128], index: 4, kind: output, shape index: {0}]   ;;  %s3431_s5 = inlined_call_operand.hbm [shape: f32[2,16,128], index: 5, kind: output, shape index: {1}]   ;;  %s3432_s6 = inlined_call_operand.hbm [shape: f32[2,16,128], index: 6, kind: output, shape index: {2}]  }
   0x1   :  { %3434 = sst [smem:[#allocation17_spill]] %s3427_s1 }
   0x2   :  { %12 = vsyncpa [#allocation4], 0 }
   0x3   :  { %13 = vsyncpa [#allocation7], 0 }
   0x4   :  { %14 = vsyncpa [#allocation5], 0 }
   0x5   :  { %16 = vsyncpa [#allocation5 + $0x1], 0 }
   0x6   :  { %17 = vsyncpa [#allocation11], 0 }
   0x7   :  { %19 = vsyncpa [#allocation11 + $0x1], 0  ;;  %s3129_s21 = smov 0   ;;  %s3131_s22 = smov 0  }
   0x8   :  { %s3133_s23 = smov 0   ;;  %s3135_s24 = smov 0  }
   0x9 LB: > { %s3150_s25 = sadd.s32 4294967295, %s3083_s24   ;;  %s3433_s26 = sadd.s32 4294967294, %s3083_s24   ;;  %s3083_s24 = sphi %s3135_s24, %s3446_s24   ;;  %s3079_s23 = sphi %s3133_s23, %s3445_s23   ;;  %s3075_s22 = sphi %s3131_s22, %s3444_s22   ;;  %s3071_s21 = sphi %s3129_s21, %s3443_s21  }
   0xa   : > { %s3154_s27 = sadd.s32 1, %s3083_s24   ;;  %s121_s28 = sadd.s32 1, %s3079_s23 }
   0xb   : > { %s118_s29 = ssub.s32 %s3083_s24, %s3154_s27  ;;  %p131_p0 = scmp.ne.s32.totalorder %s3079_s23, %s3075_s22 }
   0xc   : > { %p119_p1 = scmp.eq.s32.totalorder %s118_s29, 0  ;;  %p132_p2 = scmp.eq.s32.totalorder %s3150_s25, 1 }
   0xd   : > { %p137_p3 = scmp.ne.s32.totalorder %s3075_s22, %s3071_s21  ;;  %p138_p4 = scmp.eq.s32.totalorder %s3433_s26, 1 }
   0xe   : > { %s3167_s30 = scalar_select %p119_p1, %s3079_s23, %s121_s28  }
   0xf   : > { %p3169_p5 = por %p132_p2, %p131_p0  ;;  %p3173_p6 = por %p138_p4, %p137_p3 }
  0x10   : > { %p2002_p7 = scmp.ge.s32.totalorder %s3083_s24, 1  ;;  %p197_p8 = scmp.lt.s32.totalorder %s3083_s24, 3 }
  0x11   : > { %p2795_p9 = scmp.eq.s32.totalorder %s3150_s25, 0  ;;  %s222_s12 = sshll.u32 %s3428_s2, 4  ;;  %s223_s12 = int_to_ptr.hbm [resolvable:$true] %s222_s12 }
  0x12   : > { %p3180_p10 = pnand %p2002_p7, %p197_p8  ;;  %s3085_s13 = smov [#allocation6]  }
  0x13   : > { %s224_s14 = sshll.u32 %s3085_s13, 4  ;;  %s3439_s1 = sld [smem:[#allocation17_spill]]  ;;  %s225_s14 = int_to_ptr.vmem [resolvable:$true] %s224_s14 }
  0x14   : > { %p2775_p11 = pneg %p3180_p10  ;;  %s3086_s19 = smov 64  }
  0x15   : > { %s3087_s20 = smov 4   ;;  %s3088_s28 = smov [#allocation3]  }
  0x16   : > { %p3191_p12 = pnand %p2795_p9, %p2775_p11  ;;  %s210_s29 = sshll.u32 %s3088_s28, 4  ;;  %s211_s29 = int_to_ptr.vmem [resolvable:$true] %s210_s29 }
  0x17   : > { %s3089_s10 = smov 128   ;;  %s3090_s11 = smov 8  }
  0x18   : > { %2781 = dma.hbm_to_vmem [thread:$0]  (!%p3191_p12), %s223_s12, 3072, %s225_s14, [#allocation7], %s3086_s19, %s3086_s19, %s3087_s20  }
  0x19   : > { %s208_s18 = sshll.u32 %s3439_s1, 4  ;;  %s236_s16 = sshll.u32 %s3429_s3, 4  ;;  %s209_s18 = int_to_ptr.hbm [resolvable:$true] %s208_s18  ;;  %s237_s16 = int_to_ptr.hbm [resolvable:$true] %s236_s16 }
  0x1a   : > { %2778 = dma.hbm_to_vmem [thread:$0]  (!%p3191_p12), %s209_s18, 12288, %s211_s29, [#allocation4], %s3089_s10, %s3089_s10, %s3090_s11  }
  0x1b   : > { %s3091_s17 = smov [#allocation8]   ;;  %262 = sbr.rel (%p3180_p10) target bundleno = 482 (0x1e2), region = 36 }
  0x1c   : > { %s238_s1 = sshll.u32 %s3091_s17, 4  ;;  %s239_s1 = int_to_ptr.vmem [resolvable:$true] %s238_s1 }
  0x1d   : > { %2784 = dma.hbm_to_vmem [thread:$0]  (!%p3191_p12), %s237_s16, 3072, %s239_s1, [#allocation7], %s3086_s19, %s3086_s19, %s3087_s20  }
  0x20   : > { %3054 = dma.done.wait (%p2795_p9), [#allocation4], 12288  }
  0x21   : > { %3056 = vsyncadd (%p2795_p9), [#allocation4], 4294955008 }
  0x22   : > { %3058 = dma.done.wait (%p2795_p9), [#allocation7], 6144  }
  0x23   : > { %3060 = vsyncadd (%p2795_p9), [#allocation7], 4294961152  ;;  %p313_p13 = scmp.lt.s32.totalorder %s3150_s25, 1  ;;  %v2073_v0 = vld [vmem:[#allocation3 + $0x170] sm:$0xf]  ;;  %vm900_vm1 = vcmask 1046528  }
  0x24   : > { %v2649_v1 = vld [vmem:[#allocation3 + $0x174] sm:$0xf0]  ;;  %v2137_v2 = vld [vmem:[#allocation3 + $0x1f0] sm:$0xf]  ;;  %v2065_v5 = vld [vmem:[#allocation3 + $0x160] sm:$0xf] }
  0x25   : > { %v2074_v3 = vor.u32 %v2649_v1, %v2073_v0  ;;  %v2665_v4 = vld [vmem:[#allocation3 + $0x1f4] sm:$0xf0]  ;;  %v2647_v6 = vld [vmem:[#allocation3 + $0x164] sm:$0xf0]  ;;  %v2129_v8 = vld [vmem:[#allocation3 + $0x1e0] sm:$0xf] }
  0x26   : > { %v2138_v7 = vor.u32 %v2665_v4, %v2137_v2  ;;  %v2663_v9 = vld [vmem:[#allocation3 + $0x1e4] sm:$0xf0]  ;;  %v2066_v10 = vor.u32 %v2647_v6, %v2065_v5  ;;  %v2057_v12 = vld [vmem:[#allocation3 + $0x150] sm:$0xf]  ;;  %v2645_v13 = vld [vmem:[#allocation3 + $0x154] sm:$0xf0] }
  0x27   : > { %587 = vmatpush.bf16.msra.mxu0 %v2074_v3  ;;  %v2130_v11 = vor.u32 %v2663_v9, %v2129_v8  ;;  %v2121_v14 = vld [vmem:[#allocation3 + $0x1d0] sm:$0xf]  ;;  %v2661_v15 = vld [vmem:[#allocation3 + $0x1d4] sm:$0xf0]  ;;  %s314_s1 = scalar_select %p313_p13, %s3150_s25, 1  ;;  %v2058_v16 = vor.u32 %v2645_v13, %v2057_v12  ;;  %vm1149_vm2 = vcmask 1040384  }
  0x28   : > { %601 = vmatpush.bf16.msra.mxu1 %v2138_v7  ;;  %v2122_v17 = vor.u32 %v2661_v15, %v2121_v14  ;;  %v2049_v18 = vld [vmem:[#allocation3 + $0x140] sm:$0xf]  ;;  %v2643_v19 = vld [vmem:[#allocation3 + $0x144] sm:$0xf0]  ;;  %v2041_v24 = vld [vmem:[#allocation3 + $0x130] sm:$0xf] }
  0x29   : > { %v2113_v20 = vld [vmem:[#allocation3 + $0x1c0] sm:$0xf]  ;;  %v2659_v21 = vld [vmem:[#allocation3 + $0x1c4] sm:$0xf0]  ;;  %s2756_s26 = smul.u32 24, %s314_s1  ;;  %v2050_v22 = vor.u32 %v2643_v19, %v2049_v18  ;;  %s296_s15 = sand.u32 1, %s3075_s22  }
  0x2a   : > { %v2114_v23 = vor.u32 %v2659_v21, %v2113_v20  ;;  %v2641_v25 = vld [vmem:[#allocation3 + $0x134] sm:$0xf0]  ;;  %v2105_v26 = vld [vmem:[#allocation3 + $0x1b0] sm:$0xf]  ;;  %v2033_v29 = vld [vmem:[#allocation3 + $0x120] sm:$0xf] }
  0x2b   : > { %588 = vmatpush.bf16.msra.mxu0 %v2066_v10  ;;  %v2657_v27 = vld [vmem:[#allocation3 + $0x1b4] sm:$0xf0]  ;;  %s3224_s14 = scalar_lea.vmem %s3426_s0, %s2756_s26  ;;  %v2042_v28 = vor.u32 %v2641_v25, %v2041_v24  ;;  %v2639_v30 = vld [vmem:[#allocation3 + $0x124] sm:$0xf0]  ;;  %v2097_v35 = vld [vmem:[#allocation3 + $0x1a0] sm:$0xf] }
  0x2c   : > { %602 = vmatpush.bf16.msra.mxu1 %v2130_v11  ;;  %v2106_v31 = vor.u32 %v2657_v27, %v2105_v26  ;;  %v319_v32 = vld [vmem:[%s3224_s14] sm:$0xff]  ;;  %v3228_v33 = vld [vmem:[%s3224_s14 + $0x8] sm:$0xff]  ;;  %v353_v34 = vld [vmem:[%s3224_s14 + $0x10] sm:$0x11]  ;;  %v2034_v43 = vor.u32 %v2639_v30, %v2033_v29  ;;  %vm400_vm0 = vsmask.f32 7424 }
  0x2d   : > { %v2655_v36 = vld [vmem:[#allocation3 + $0x1a4] sm:$0xf0]  ;;  %v390_v37 = vunpack.c.l.b16 %v319_v32  ;;  %v392_v38 = vunpack.c.l.b16 %v3228_v33  ;;  %v394_v39 = vunpack.c.l.b16 %v353_v34  ;;  %v391_v40 = vunpack.c.h.b16 %v319_v32  ;;  %v2025_v47 = vld [vmem:[#allocation3 + $0x110] sm:$0xf]  ;;  %v2637_v48 = vld [vmem:[#allocation3 + $0x114] sm:$0xf0] }
  0x2e   : > { %v393_v41 = vunpack.c.h.b16 %v3228_v33  ;;  %v395_v42 = vunpack.c.h.b16 %v353_v34  ;;  %v2098_v46 = vor.u32 %v2655_v36, %v2097_v35  ;;  %v2089_v51 = vld [vmem:[#allocation3 + $0x190] sm:$0xf]  ;;  %v2653_v52 = vld [vmem:[#allocation3 + $0x194] sm:$0xf0]  ;;  %v2017_v54 = vld [vmem:[#allocation3 + $0x100] sm:$0xf]  ;;  %v2026_v57 = vor.u32 %v2637_v48, %v2025_v47 }
  0x2f   : > { %589 = vmatpush.bf16.msra.mxu0 %v2058_v16  ;;  %v3235_v44 = vpack.c.b16 %v392_v38, %v390_v37  ;;  %v3237_v45 = vpack.c.b16 %v394_v39, %v394_v39  ;;  %v2635_v55 = vld [vmem:[#allocation3 + $0x104] sm:$0xf0]  ;;  %v2081_v58 = vld [vmem:[#allocation3 + $0x180] sm:$0xf]  ;;  %v2090_v62 = vor.u32 %v2653_v52, %v2089_v51  ;;  %v2201_v3 = vld [vmem:[#allocation3 + $0x70] sm:$0xf] }
  0x30   : > { %603 = vmatpush.bf16.msra.mxu1 %v2122_v17  ;;  %v3241_v49 = vpack.c.b16 %v393_v41, %v391_v40  ;;  %v3243_v50 = vpack.c.b16 %v395_v42, %v395_v42  ;;  %v2651_v63 = vld [vmem:[#allocation3 + $0x184] sm:$0xf0]  ;;  %v2617_v4 = vld [vmem:[#allocation3 + $0x74] sm:$0xf0]  ;;  %v2265_v5 = vld [vmem:[#allocation3 + $0xf0] sm:$0xf]  ;;  %v2018_v7 = vor.u32 %v2635_v55, %v2017_v54 }
  0x31   : > { %v404_v53 = vshll.u32 %v3235_v44, 16  ;;  %v402_v59 = vshrl.u32 %v3235_v44, 16  ;;  %v409_v61 = vshll.u32 %v3237_v45, 16  ;;  %v2633_v6 = vld [vmem:[#allocation3 + $0xf4] sm:$0xf0]  ;;  %v2082_v8 = vor.u32 %v2651_v63, %v2081_v58  ;;  %s3323_s18 = sshll.u32 %s296_s15, 4 }
  0x32   : > { %v416_v56 = vshll.u32 %v3241_v49, 16  ;;  %v414_v0 = vshrl.u32 %v3241_v49, 16  ;;  %v421_v2 = vshll.u32 %v3243_v50, 16  ;;  %v2202_v11 = vor.u32 %v2617_v4, %v2201_v3  ;;  %v2193_v15 = vld [vmem:[#allocation3 + $0x60] sm:$0xf]  ;;  %s3327_s19 = scalar_lea.vmem [#allocation10], %s3323_s18 }
  0x33   : > { %590 = vmatpush.bf16.msra.mxu0 %v2050_v22  ;;  %v406_v60 = vrot.slane %v404_v53, 1  ;;  %v411_v10 = vrot.slane %v409_v61, 1  ;;  %v2266_v14 = vor.u32 %v2633_v6, %v2265_v5  ;;  %v2615_v16 = vld [vmem:[#allocation3 + $0x64] sm:$0xf0]  ;;  %v2257_v17 = vld [vmem:[#allocation3 + $0xe0] sm:$0xf] }
  0x34   : > { %604 = vmatpush.bf16.msra.mxu1 %v2114_v23  ;;  %v418_v1 = vrot.slane %v416_v56, 1  ;;  %v423_v13 = vrot.slane %v421_v2, 1  ;;  %v2631_v18 = vld [vmem:[#allocation3 + $0xe4] sm:$0xf0]  ;;  %v2194_v20 = vor.u32 %v2615_v16, %v2193_v15  ;;  %v2185_v23 = vld [vmem:[#allocation3 + $0x50] sm:$0xf] }
  0x35   : > { %v407_v9 = vor.u32 %v406_v60, %v402_v59  ;;  %v2258_v22 = vor.u32 %v2631_v18, %v2257_v17  ;;  %v2613_v24 = vld [vmem:[#allocation3 + $0x54] sm:$0xf0]  ;;  %v2249_v25 = vld [vmem:[#allocation3 + $0xd0] sm:$0xf]  ;;  %v2177_v29 = vld [vmem:[#allocation3 + $0x40] sm:$0xf] }
  0x36   : > { %v419_v12 = vor.u32 %v418_v1, %v414_v0  ;;  %v2629_v26 = vld [vmem:[#allocation3 + $0xd4] sm:$0xf0]  ;;  %v2186_v27 = vor.u32 %v2613_v24, %v2185_v23  ;;  %v2611_v30 = vld [vmem:[#allocation3 + $0x44] sm:$0xf0]  ;;  %v2169_v36 = vld [vmem:[#allocation3 + $0x30] sm:$0xf] }
  0x37   : > { %591 = vmatpush.bf16.msra.mxu0 %v2042_v28  ;;  %v3252_v19 = vsel %vm400_vm0, %v407_v9, %v411_v10  ;;  %v2250_v28 = vor.u32 %v2629_v26, %v2249_v25  ;;  %v2627_v32 = vld [vmem:[#allocation3 + $0xc4] sm:$0xf0]  ;;  %v2178_v34 = vor.u32 %v2611_v30, %v2177_v29  ;;  %v2609_v37 = vld [vmem:[#allocation3 + $0x34] sm:$0xf0]  ;;  %v2233_v39 = vld [vmem:[#allocation3 + $0xb0] sm:$0xf] }
  0x38   : > { %605 = vmatpush.bf16.msra.mxu1 %v2106_v31  ;;  %v3255_v21 = vsel %vm400_vm0, %v419_v12, %v423_v13  ;;  %v2241_v31 = vld [vmem:[#allocation3 + $0xc0] sm:$0xf]  ;;  %v2625_v40 = vld [vmem:[#allocation3 + $0xb4] sm:$0xf0]  ;;  %v2170_v42 = vor.u32 %v2609_v37, %v2169_v36  ;;  %v2607_v47 = vld [vmem:[#allocation3 + $0x24] sm:$0xf0] }
  0x39   : > { %v2242_v35 = vor.u32 %v2627_v32, %v2241_v31  ;;  %v2225_v48 = vld [vmem:[#allocation3 + $0xa0] sm:$0xf]  ;;  %v2623_v51 = vld [vmem:[#allocation3 + $0xa4] sm:$0xf0]  ;;  %v2153_v54 = vld [vmem:[#allocation3 + $0x10] sm:$0xf] }
  0x3a   : > { %v2226_v53 = vor.u32 %v2623_v51, %v2225_v48  ;;  %v2605_v55 = vld [vmem:[#allocation3 + $0x14] sm:$0xf0]  ;;  %v2217_v56 = vld [vmem:[#allocation3 + $0x90] sm:$0xf]  ;;  %v2145_v60 = vld [vmem:[#allocation3] sm:$0xf] }
  0x3b   : > { %592 = vmatpush.bf16.msra.mxu0 %v2034_v43  ;;  %v2234_v43 = vor.u32 %v2625_v40, %v2233_v39  ;;  %v2154_v58 = vor.u32 %v2605_v55, %v2153_v54  ;;  %v2603_v61 = vld [vmem:[#allocation3 + $0x4] sm:$0xf0]  ;;  %v2329_v0 = vld [vmem:[#allocation3 + $0x270] sm:$0xf]  ;;  %v2681_v1 = vld [vmem:[#allocation3 + $0x274] sm:$0xf0] }
  0x3c   : > { %606 = vmatpush.bf16.msra.mxu1 %v2098_v46  ;;  %v2161_v46 = vld [vmem:[#allocation3 + $0x20] sm:$0xf]  ;;  %v2619_v63 = vld [vmem:[#allocation3 + $0x84] sm:$0xf0]  ;;  %v2393_v2 = vld [vmem:[#allocation3 + $0x2f0] sm:$0xf]  ;;  %v2146_v4 = vor.u32 %v2603_v61, %v2145_v60  ;;  %v2330_v6 = vor.u32 %v2681_v1, %v2329_v0 }
  0x3d   : > { %v2162_v52 = vor.u32 %v2607_v47, %v2161_v46  ;;  %v2697_v3 = vld [vmem:[#allocation3 + $0x2f4] sm:$0xf0]  ;;  %v2679_v9 = vld [vmem:[#allocation3 + $0x264] sm:$0xf0]  ;;  %v2385_v10 = vld [vmem:[#allocation3 + $0x2e0] sm:$0xf] }
  0x3e   : > { %v2313_v12 = vld [vmem:[#allocation3 + $0x250] sm:$0xf]  ;;  %v2677_v13 = vld [vmem:[#allocation3 + $0x254] sm:$0xf0]  ;;  %v2648_v16 = vld [vmem:[#allocation3 + $0x174] sm:$0xf] }
  0x3f   : > { %593 = vmatpush.bf16.msra.mxu0 %v2026_v57  ;;  %v2621_v57 = vld [vmem:[#allocation3 + $0x94] sm:$0xf0]  ;;  %v2377_v15 = vld [vmem:[#allocation3 + $0x2d0] sm:$0xf]  ;;  %v2075_v17 = vld [vmem:[#allocation3 + $0x178] sm:$0xf0]  ;;  %v2314_v31 = vor.u32 %v2677_v13, %v2313_v12 }
  0x40   : > { %607 = vmatpush.bf16.msra.mxu1 %v2090_v62  ;;  %v2218_v59 = vor.u32 %v2621_v57, %v2217_v56  ;;  %v2209_v62 = vld [vmem:[#allocation3 + $0x80] sm:$0xf]  ;;  %v2664_v18 = vld [vmem:[#allocation3 + $0x1f4] sm:$0xf]  ;;  %v2139_v23 = vld [vmem:[#allocation3 + $0x1f8] sm:$0xf0] }
  0x41   : > { %v2210_v5 = vor.u32 %v2619_v63, %v2209_v62  ;;  %v2646_v24 = vld [vmem:[#allocation3 + $0x164] sm:$0xf]  ;;  %v2067_v25 = vld [vmem:[#allocation3 + $0x168] sm:$0xf0]  ;;  %v2693_v26 = vld [vmem:[#allocation3 + $0x2d4] sm:$0xf0] }
  0x42   : > { %v2131_v29 = vld [vmem:[#allocation3 + $0x1e8] sm:$0xf0]  ;;  %v2070_v30 = vor.u32 %v2646_v24, %v2067_v25  ;;  %v2305_v32 = vld [vmem:[#allocation3 + $0x240] sm:$0xf]  ;;  %v2059_v36 = vld [vmem:[#allocation3 + $0x158] sm:$0xf0]  ;;  %v2378_v37 = vor.u32 %v2693_v26, %v2377_v15 }
  0x43   : > { %594 = vmatpush.bf16.msra.mxu0 %v2018_v7  ;;  %v2394_v7 = vor.u32 %v2697_v3, %v2393_v2  ;;  %v2675_v39 = vld [vmem:[#allocation3 + $0x244] sm:$0xf0]  ;;  %v2660_v40 = vld [vmem:[#allocation3 + $0x1d4] sm:$0xf]  ;;  %v2297_v51 = vld [vmem:[#allocation3 + $0x230] sm:$0xf] }
  0x44   : > { %608 = vmatpush.bf16.msra.mxu1 %v2082_v8  ;;  %v2321_v8 = vld [vmem:[#allocation3 + $0x260] sm:$0xf]  ;;  %v2691_v46 = vld [vmem:[#allocation3 + $0x2c4] sm:$0xf0]  ;;  %v2306_v48 = vor.u32 %v2675_v39, %v2305_v32  ;;  %v2051_v54 = vld [vmem:[#allocation3 + $0x148] sm:$0xf0] }
  0x45   : > { %v2673_v56 = vld [vmem:[#allocation3 + $0x234] sm:$0xf0]  ;;  %v2658_v57 = vld [vmem:[#allocation3 + $0x1c4] sm:$0xf]  ;;  %v2289_v61 = vld [vmem:[#allocation3 + $0x220] sm:$0xf] }
  0x46   : > { %595 = vmatmul.bf16.vlgmr.msra.gmra.mxu0 %v3252_v19  ;;  %v2689_v60 = vld [vmem:[#allocation3 + $0x2b4] sm:$0xf0]  ;;  %v2298_v63 = vor.u32 %v2673_v56, %v2297_v51  ;;  %v2640_v2 = vld [vmem:[#allocation3 + $0x134] sm:$0xf]  ;;  %v2043_v3 = vld [vmem:[#allocation3 + $0x138] sm:$0xf0] }
  0x47   : > { %805 = vmatpush.bf16.msrb.mxu0 %v2202_v11  ;;  %609 = vmatmul.bf16.vlgmr.msra.gmra.mxu1 %v3255_v21  ;;  %v2695_v11 = vld [vmem:[#allocation3 + $0x2e4] sm:$0xf0]  ;;  %v861_v0 = vld [vmem:[%s3224_s14] sm:$0xee]  ;;  %v2281_v13 = vld [vmem:[#allocation3 + $0x210] sm:$0xf] }
  0x48   : > { %819 = vmatpush.bf16.msrb.mxu1 %v2266_v14  ;;  %v2322_v14 = vor.u32 %v2679_v9, %v2321_v8  ;;  %v2353_v8 = vld [vmem:[#allocation3 + $0x2a0] sm:$0xf]  ;;  %v2687_v9 = vld [vmem:[#allocation3 + $0x2a4] sm:$0xf0]  ;;  %v2345_v24 = vld [vmem:[#allocation3 + $0x290] sm:$0xf] }
  0x49   : > { %v2685_v25 = vld [vmem:[#allocation3 + $0x294] sm:$0xf0]  ;;  %v2636_v32 = vld [vmem:[#allocation3 + $0x114] sm:$0xf]  ;;  %v2091_v39 = vld [vmem:[#allocation3 + $0x198] sm:$0xf0] }
  0x4a   : > { %v2634_v51 = vld [vmem:[#allocation3 + $0x104] sm:$0xf]  ;;  %v2616_v56 = vld [vmem:[#allocation3 + $0x74] sm:$0xf]  ;;  %vm1150_vm3 = vsmask.f32 256 }
  0x4b   : > { %806 = vmatpush.bf16.msrb.mxu0 %v2194_v20  ;;  %v2386_v20 = vor.u32 %v2695_v11, %v2385_v10  ;;  %v896_v10 = vunpack.c.l.b16 %v861_v0  ;;  %v2046_v11 = vor.u32 %v2640_v2, %v2043_v3  ;;  %v2630_v2 = vld [vmem:[#allocation3 + $0xe4] sm:$0xf]  ;;  %v2259_v3 = vld [vmem:[#allocation3 + $0xe8] sm:$0xf0]  ;;  %vm3289_vm4 = vmand %vm1149_vm2, %vm1150_vm3  ;;  %vm1155_vm5 = vsmask.f32 7938 }
  0x4c   : > { %820 = vmatpush.bf16.msrb.mxu1 %v2258_v22  ;;  %v2078_v22 = vor.u32 %v2648_v16, %v2075_v17  ;;  %v2638_v16 = vld [vmem:[#allocation3 + $0x124] sm:$0xf]  ;;  %v2035_v17 = vld [vmem:[#allocation3 + $0x128] sm:$0xf0]  ;;  %vm1156_vm6 = vmand %vm1149_vm2, %vm1155_vm5  ;;  %vm1203_vm7 = vcmask 1043456   ;;  %s3339_s20 = sshll.u32 %s3150_s25, 4 }
  0x4d   : > { %v898_v26 = vpack.c.b16 %v392_v38, %v896_v10  ;;  %vm1204_vm8 = vmand %vm1203_vm7, %vm1155_vm5  ;;  %vm1181_vm9 = vsmask.f32 4368  ;;  %s1824_s10 = scalar_lea.hbm %s3431_s5, %s3339_s20  ;;  %s1790_s11 = sand.u32 1, %s3150_s25  }
  0x4e   : > { %615 = vmatpush.bf16.msra.mxu2 %v2078_v22  ;;  %v2654_v22 = vld [vmem:[#allocation3 + $0x1a4] sm:$0xf]  ;;  %vm1182_vm10 = vmor %vm1150_vm3, %vm1181_vm9  ;;  %s1825_s13 = sshll.u32 %s3327_s19, 4  ;;  %s1827_s16 = sshll.u32 %s1824_s10, 4  ;;  %s1826_s13 = int_to_ptr.vmem [resolvable:$true] %s1825_s13  ;;  %s1828_s16 = int_to_ptr.hbm [resolvable:$true] %s1827_s16 }
  0x4f   : > { %807 = vmatpush.bf16.msrb.mxu0 %v2186_v27  ;;  %v2142_v27 = vor.u32 %v2664_v18, %v2139_v23  ;;  %v2354_v18 = vor.u32 %v2687_v9, %v2353_v8  ;;  %v2099_v23 = vld [vmem:[#allocation3 + $0x1a8] sm:$0xf0]  ;;  %v901_v38 = vrot.slane %v898_v26, 1  ;;  %v2628_v8 = vld [vmem:[#allocation3 + $0xd4] sm:$0xf]  ;;  %s3347_s17 = scalar_lea.sflag [#allocation11], %s1790_s11 }
  0x50   : > { %821 = vmatpush.bf16.msrb.mxu1 %v2250_v28  ;;  %v2662_v28 = vld [vmem:[#allocation3 + $0x1e4] sm:$0xf]  ;;  %v2251_v9 = vld [vmem:[#allocation3 + $0xd8] sm:$0xf0]  ;;  %s2967_s1 = sshra.s32 %s1828_s16, 4  ;;  %s2968_s1 = int_to_ptr.hbm [resolvable:$true] %s2967_s1 }
  0x51   : > { %629 = vmatpush.bf16.msra.mxu3 %v2142_v27  ;;  %v2038_v27 = vor.u32 %v2638_v16, %v2035_v17  ;;  %v2622_v26 = vld [vmem:[#allocation3 + $0xa4] sm:$0xf]  ;;  %s2969_s26 = scalar_lea.hbm %s2968_s1, 16  ;;  %p2974_p3 = scmp.lt.s32.totalorder %s2968_s1, %s3431_s5 }
  0x52   : > { %616 = vmatpush.bf16.msra.mxu2 %v2070_v30  ;;  %p2970_p0 = scmp.ne.s32.totalorder %s2968_s1, %s2969_s26 }
  0x53   : > { %808 = vmatpush.bf16.msrb.mxu0 %v2178_v34  ;;  %v2134_v34 = vor.u32 %v2662_v28, %v2131_v29  ;;  %v2273_v29 = vld [vmem:[#allocation3 + $0x200] sm:$0xf] }
  0x54   : > { %822 = vmatpush.bf16.msrb.mxu1 %v2242_v35  ;;  %v2644_v35 = vld [vmem:[#allocation3 + $0x154] sm:$0xf]  ;;  %p2971_p1 = pnand %p2970_p0, %p3169_p5 }
  0x55   : > { %v2062_v47 = vor.u32 %v2644_v35, %v2059_v36  ;;  %630 = vmatpush.bf16.msra.mxu3 %v2134_v34  ;;  %v2027_v34 = vld [vmem:[#allocation3 + $0x118] sm:$0xf0]  ;;  %v2346_v35 = vor.u32 %v2685_v25, %v2345_v24  ;;  %v2667_v36 = vld [vmem:[#allocation3 + $0x204] sm:$0xf0]  ;;  %v2606_v24 = vld [vmem:[#allocation3 + $0x24] sm:$0xf] }
  0x56   : > { %v2274_v33 = vor.u32 %v2667_v36, %v2273_v29  ;;  %v2163_v25 = vld [vmem:[#allocation3 + $0x28] sm:$0xf0]  ;;  %v2604_v29 = vld [vmem:[#allocation3 + $0x14] sm:$0xf]  ;;  %p2972_p2 = pneg %p2971_p1 }
  0x57   : > { %809 = vmatpush.bf16.msrb.mxu0 %v2170_v42  ;;  %v2123_v42 = vld [vmem:[#allocation3 + $0x1d8] sm:$0xf0]  ;;  %617 = vmatpush.bf16.msra.mxu2 %v2062_v47  ;;  %v905_v47 = vrot.slane %v3243_v50, 1 }
  0x58   : > { %823 = vmatpush.bf16.msrb.mxu1 %v2234_v43  ;;  %v2369_v43 = vld [vmem:[#allocation3 + $0x2c0] sm:$0xf] }
  0x59   : > { %v2370_v55 = vor.u32 %v2691_v46, %v2369_v43  ;;  %v902_v43 = vrot.slane %v3237_v45, 1  ;;  %v2030_v46 = vor.u32 %v2636_v32, %v2027_v34  ;;  %v2620_v32 = vld [vmem:[#allocation3 + $0x94] sm:$0xf]  ;;  %v2219_v34 = vld [vmem:[#allocation3 + $0x98] sm:$0xf0] }
  0x5a   : > { %v2222_v36 = vor.u32 %v2620_v32, %v2219_v34  ;;  %v2711_v34 = vld [vmem:[#allocation6 + $0x68] sm:$0xff] }
  0x5b   : > { %810 = vmatpush.bf16.msrb.mxu0 %v2162_v52  ;;  %v2126_v52 = vor.u32 %v2660_v40, %v2123_v42  ;;  %v2337_v40 = vld [vmem:[#allocation3 + $0x280] sm:$0xf]  ;;  %v2683_v42 = vld [vmem:[#allocation3 + $0x284] sm:$0xf0] }
  0x5c   : > { %824 = vmatpush.bf16.msrb.mxu1 %v2226_v53  ;;  %v2642_v53 = vld [vmem:[#allocation3 + $0x144] sm:$0xf] }
  0x5d   : > { %v2054_v62 = vor.u32 %v2642_v53, %v2051_v54  ;;  %631 = vmatpush.bf16.msra.mxu3 %v2126_v52  ;;  %v2019_v52 = vld [vmem:[#allocation3 + $0x108] sm:$0xf0]  ;;  %v2338_v53 = vor.u32 %v2683_v42, %v2337_v40  ;;  %v2650_v54 = vld [vmem:[#allocation3 + $0x184] sm:$0xf] }
  0x5e   : > { %v2022_v45 = vor.u32 %v2634_v51, %v2019_v52  ;;  %v2618_v40 = vld [vmem:[#allocation3 + $0x84] sm:$0xf] }
  0x5f   : > { %811 = vmatpush.bf16.msrb.mxu0 %v2154_v58  ;;  %v2115_v58 = vld [vmem:[#allocation3 + $0x1c8] sm:$0xf0]  ;;  %618 = vmatpush.bf16.msra.mxu2 %v2054_v62  ;;  %v2678_v51 = vld [vmem:[#allocation3 + $0x264] sm:$0xf] }
  0x60   : > { %825 = vmatpush.bf16.msrb.mxu1 %v2218_v59  ;;  %v2361_v59 = vld [vmem:[#allocation3 + $0x2b0] sm:$0xf]  ;;  %v2118_v1 = vor.u32 %v2658_v57, %v2115_v58  ;;  %v2203_v57 = vld [vmem:[#allocation3 + $0x78] sm:$0xf0]  ;;  %v2632_v58 = vld [vmem:[#allocation3 + $0xf4] sm:$0xf] }
  0x61   : > { %v2206_v62 = vor.u32 %v2616_v56, %v2203_v57 }
  0x62   : > { %632 = vmatpush.bf16.msra.mxu3 %v2118_v1  ;;  %v2195_v1 = vld [vmem:[#allocation3 + $0x68] sm:$0xf0] }
  0x63   : > { %812 = vmatpush.bf16.msrb.mxu0 %v2146_v4  ;;  %v2362_v4 = vor.u32 %v2689_v60, %v2361_v59  ;;  %619 = vmatpush.bf16.msra.mxu2 %v2046_v11  ;;  %v2267_v59 = vld [vmem:[#allocation3 + $0xf8] sm:$0xf0]  ;;  %v3269_v60 = vsel %vm900_vm1, %v901_v38, %v902_v43  ;;  %v2254_v11 = vor.u32 %v2628_v8, %v2251_v9  ;;  %v2211_v38 = vld [vmem:[#allocation3 + $0x88] sm:$0xf0]  ;;  %v2680_v43 = vld [vmem:[#allocation3 + $0x274] sm:$0xf] }
  0x64   : > { %826 = vmatpush.bf16.msrb.mxu1 %v2210_v5  ;;  %v2671_v5 = vld [vmem:[#allocation3 + $0x224] sm:$0xf0]  ;;  %v2363_v8 = vld [vmem:[#allocation3 + $0x2b8] sm:$0xf0] }
  0x65   : > { %v2290_v12 = vor.u32 %v2671_v5, %v2289_v61  ;;  %v2262_v5 = vor.u32 %v2630_v2, %v2259_v3  ;;  %v2690_v2 = vld [vmem:[#allocation3 + $0x2c4] sm:$0xf] }
  0x66   : > { %813 = vmatmul.bf16.vlgmr.msrb.gmra.mxu0 %v3235_v44 }
  0x67   : > { %1069 = vmatpush.bf16.msra.mxu0 %v2330_v6  ;;  %827 = vmatmul.bf16.vlgmr.msrb.gmra.mxu1 %v3241_v49  ;;  %v2656_v6 = vld [vmem:[#allocation3 + $0x1b4] sm:$0xf] }
  0x68   : > { %1083 = vmatpush.bf16.msra.mxu1 %v2394_v7  ;;  %v2107_v7 = vld [vmem:[#allocation3 + $0x1b8] sm:$0xf0]  ;;  %620 = vmatpush.bf16.msra.mxu2 %v2038_v27  ;;  %v2166_v27 = vor.u32 %v2606_v24, %v2163_v25  ;;  %v2666_v25 = vld [vmem:[#allocation3 + $0x204] sm:$0xf] }
  0x69   : > { %v2110_v15 = vor.u32 %v2656_v6, %v2107_v7  ;;  %v2612_v6 = vld [vmem:[#allocation3 + $0x54] sm:$0xf]  ;;  %v2187_v7 = vld [vmem:[#allocation3 + $0x58] sm:$0xf0] }
  0x6a   : > { %v2190_v10 = vor.u32 %v2612_v6, %v2187_v7  ;;  %v2688_v6 = vld [vmem:[#allocation3 + $0x2b4] sm:$0xf] }
  0x6b   : > { %1070 = vmatpush.bf16.msra.mxu0 %v2322_v14  ;;  %v897_v14 = vunpack.c.h.b16 %v861_v0  ;;  %633 = vmatpush.bf16.msra.mxu3 %v2110_v15  ;;  %v2614_v0 = vld [vmem:[#allocation3 + $0x64] sm:$0xf]  ;;  %v2243_v15 = vld [vmem:[#allocation3 + $0xc8] sm:$0xf0]  ;;  %v2366_v9 = vor.u32 %v2688_v6, %v2363_v8  ;;  %v2745_v6 = vld [vmem:[#allocation8 + $0xb8] sm:$0xff] }
  0x6c   : > { %1084 = vmatpush.bf16.msra.mxu1 %v2386_v20  ;;  %v2669_v20 = vld [vmem:[#allocation3 + $0x214] sm:$0xf0]  ;;  %621 = vmatpush.bf16.msra.mxu2 %v2030_v46  ;;  %v2331_v46 = vld [vmem:[#allocation3 + $0x278] sm:$0xf0]  ;;  %v3307_v8 = vld [vmem:[%s3224_s14 + $0x10] sm:$0x1] }
  0x6d   : > { %v2282_v28 = vor.u32 %v2669_v20, %v2281_v13  ;;  %v899_v30 = vpack.c.b16 %v393_v41, %v897_v14  ;;  %v2179_v13 = vld [vmem:[#allocation3 + $0x48] sm:$0xf0]  ;;  %v2626_v14 = vld [vmem:[#allocation3 + $0xc4] sm:$0xf]  ;;  %v2171_v20 = vld [vmem:[#allocation3 + $0x38] sm:$0xf0] }
  0x6e   : > { %v2246_v17 = vor.u32 %v2626_v14, %v2243_v15  ;;  %v2355_v14 = vld [vmem:[#allocation3 + $0x2a8] sm:$0xf0] }
  0x6f   : > { %1071 = vmatpush.bf16.msra.mxu0 %v2314_v31  ;;  %v2102_v31 = vor.u32 %v2654_v22, %v2099_v23  ;;  %v904_v41 = vrot.slane %v899_v30, 1  ;;  %v2624_v22 = vld [vmem:[#allocation3 + $0xb4] sm:$0xf]  ;;  %v2235_v23 = vld [vmem:[#allocation3 + $0xb8] sm:$0xf0] }
  0x70   : > { %1085 = vmatpush.bf16.msra.mxu1 %v2378_v37  ;;  %v2652_v37 = vld [vmem:[#allocation3 + $0x194] sm:$0xf]  ;;  %622 = vmatpush.bf16.msra.mxu2 %v2022_v45  ;;  %v2155_v30 = vld [vmem:[#allocation3 + $0x18] sm:$0xf0] }
  0x71   : > { %634 = vmatpush.bf16.msra.mxu3 %v2102_v31  ;;  %v3272_v61 = vsel %vm900_vm1, %v904_v41, %v905_v47  ;;  %v2334_v41 = vor.u32 %v2680_v43, %v2331_v46  ;;  %v2696_v47 = vld [vmem:[#allocation3 + $0x2f4] sm:$0xf]  ;;  %v2702_v43 = vld [vmem:[#allocation6 + $0x20] sm:$0xff] }
  0x72   : > { %v2692_v45 = vld [vmem:[#allocation3 + $0x2d4] sm:$0xf] }
  0x73   : > { %1072 = vmatpush.bf16.msra.mxu0 %v2306_v48  ;;  %v2094_v48 = vor.u32 %v2652_v37, %v2091_v39  ;;  %623 = vmatmul.bf16.vlgmr.msra.gmra.mxu2 %v3252_v19  ;;  %v2602_v37 = vld [vmem:[#allocation3 + $0x4] sm:$0xf]  ;;  %v2147_v39 = vld [vmem:[#allocation3 + $0x8] sm:$0xf0]  ;;  %v2720_v46 = vld [vmem:[#allocation6 + $0xb0] sm:$0xff] }
  0x74   : > { %1086 = vmatpush.bf16.msra.mxu1 %v2370_v55  ;;  %v2083_v55 = vld [vmem:[#allocation3 + $0x188] sm:$0xf0]  ;;  %833 = vmatpush.bf16.msrb.mxu2 %v2206_v62  ;;  %v2150_v42 = vor.u32 %v2602_v37, %v2147_v39  ;;  %v2379_v62 = vld [vmem:[#allocation3 + $0x2d8] sm:$0xf0] }
  0x75   : > { %635 = vmatpush.bf16.msra.mxu3 %v2094_v48  ;;  %v2086_v50 = vor.u32 %v2650_v54, %v2083_v55  ;;  %v2395_v48 = vld [vmem:[#allocation3 + $0x2f8] sm:$0xf0]  ;;  %v2694_v54 = vld [vmem:[#allocation3 + $0x2e4] sm:$0xf]  ;;  %v2387_v55 = vld [vmem:[#allocation3 + $0x2e8] sm:$0xf0] }
  0x76   : > { %v2398_v52 = vor.u32 %v2696_v47, %v2395_v48  ;;  %v2390_v57 = vor.u32 %v2694_v54, %v2387_v55  ;;  %v2707_v47 = vld [vmem:[#allocation6 + $0x48] sm:$0xff]  ;;  %v1157_v54 = vld [vmem:[#allocation2 + $0x8] sm:$0x1] }
  0x77   : > { %1073 = vmatpush.bf16.msra.mxu0 %v2298_v63  ;;  %v2270_v63 = vor.u32 %v2632_v58, %v2267_v59  ;;  %v2676_v58 = vld [vmem:[#allocation3 + $0x254] sm:$0xf]  ;;  %v2315_v59 = vld [vmem:[#allocation3 + $0x258] sm:$0xf0]  ;;  %v2719_v48 = vld [vmem:[#allocation6 + $0xa8] sm:$0xff] }
  0x78   : > { %1087 = vmatpush.bf16.msra.mxu1 %v2362_v4  ;;  %v2198_v4 = vor.u32 %v2614_v0, %v2195_v1  ;;  %v2674_v0 = vld [vmem:[#allocation3 + $0x244] sm:$0xf]  ;;  %v2307_v1 = vld [vmem:[#allocation3 + $0x248] sm:$0xf0] }
  0x79   : > { %636 = vmatpush.bf16.msra.mxu3 %v2086_v50  ;;  %v2318_v50 = vor.u32 %v2676_v58, %v2315_v59  ;;  %v2310_v3 = vor.u32 %v2674_v0, %v2307_v1  ;;  %v2718_v58 = vld [vmem:[#allocation6 + $0xa0] sm:$0xff]  ;;  %v2729_v59 = vld [vmem:[#allocation8 + $0x38] sm:$0xff]  ;;  %v2728_v0 = vld [vmem:[#allocation8 + $0x30] sm:$0xff] }
  0x7a   : > { %834 = vmatpush.bf16.msrb.mxu2 %v2198_v4  ;;  %v2371_v4 = vld [vmem:[#allocation3 + $0x2c8] sm:$0xf0] }
  0x7b   : > { %1074 = vmatpush.bf16.msra.mxu0 %v2290_v12  ;;  %v2610_v12 = vld [vmem:[#allocation3 + $0x44] sm:$0xf] }
  0x7c   : > { %1088 = vmatpush.bf16.msra.mxu1 %v2354_v18  ;;  %637 = vmatmul.bf16.vlgmr.msra.gmra.mxu3 %v3255_v21  ;;  %v2182_v16 = vor.u32 %v2610_v12, %v2179_v13  ;;  %v2608_v18 = vld [vmem:[#allocation3 + $0x34] sm:$0xf]  ;;  %v2238_v21 = vor.u32 %v2624_v22, %v2235_v23  ;;  %v2686_v12 = vld [vmem:[#allocation3 + $0x2a4] sm:$0xf]  ;;  %v2347_v22 = vld [vmem:[#allocation3 + $0x298] sm:$0xf0] }
  0x7d   : > { %847 = vmatpush.bf16.msrb.mxu3 %v2270_v63  ;;  %v2174_v19 = vor.u32 %v2608_v18, %v2171_v20  ;;  %v2382_v63 = vor.u32 %v2692_v45, %v2379_v62  ;;  %v2358_v15 = vor.u32 %v2686_v12, %v2355_v14  ;;  %v2713_v18 = vld [vmem:[#allocation6 + $0x78] sm:$0xff]  ;;  %v2684_v20 = vld [vmem:[#allocation3 + $0x294] sm:$0xf]  ;;  %v2699_v45 = vld [vmem:[#allocation6 + $0x8] sm:$0xff]  ;;  %v1253_v12 = vunpack.c.l.b16 %v3307_v8 }
  0x7e   : > { %835 = vmatpush.bf16.msrb.mxu2 %v2190_v10  ;;  %v2670_v10 = vld [vmem:[#allocation3 + $0x224] sm:$0xf]  ;;  %v2712_v23 = vld [vmem:[#allocation6 + $0x70] sm:$0xff]  ;;  %v2350_v24 = vor.u32 %v2684_v20, %v2347_v22  ;;  %v2717_v62 = vld [vmem:[#allocation6 + $0x98] sm:$0xff] }
  0x7f   : > { %1075 = vmatpush.bf16.msra.mxu0 %v2282_v28  ;;  %v2227_v28 = vld [vmem:[#allocation3 + $0xa8] sm:$0xf0]  ;;  %v2726_v20 = vld [vmem:[#allocation8 + $0x20] sm:$0xff] }
  0x80   : > { %1089 = vmatpush.bf16.msra.mxu1 %v2346_v35  ;;  %v2230_v31 = vor.u32 %v2622_v26, %v2227_v28  ;;  %v2158_v35 = vor.u32 %v2604_v29, %v2155_v30  ;;  %v2275_v26 = vld [vmem:[#allocation3 + $0x208] sm:$0xf0] }
  0x81   : > { %848 = vmatpush.bf16.msrb.mxu3 %v2262_v5  ;;  %v2374_v5 = vor.u32 %v2690_v2, %v2371_v4  ;;  %v2339_v28 = vld [vmem:[#allocation3 + $0x288] sm:$0xf0]  ;;  %v2278_v29 = vor.u32 %v2666_v25, %v2275_v26  ;;  %v3299_v2 = vld [vmem:[%s3224_s14] sm:$0xf]  ;;  %v2698_v4 = vld [vmem:[#allocation6] sm:$0xff] }
  0x82   : > { %836 = vmatpush.bf16.msrb.mxu2 %v2182_v16  ;;  %v2668_v16 = vld [vmem:[#allocation3 + $0x214] sm:$0xf] }
  0x83   : > { %1076 = vmatpush.bf16.msra.mxu0 %v2274_v33  ;;  %v2214_v33 = vor.u32 %v2618_v40, %v2211_v38  ;;  %v2703_v40 = vld [vmem:[#allocation6 + $0x28] sm:$0xff]  ;;  %v2721_v38 = vld [vmem:[#allocation6 + $0xb8] sm:$0xff]  ;;  %v2736_v25 = vld [vmem:[#allocation8 + $0x70] sm:$0xff] }
  0x84   : > { %1090 = vmatpush.bf16.msra.mxu1 %v2338_v53  ;;  %v2323_v53 = vld [vmem:[#allocation3 + $0x268] sm:$0xf0] }
  0x85   : > { %849 = vmatpush.bf16.msrb.mxu3 %v2254_v11  ;;  %v2326_v56 = vor.u32 %v2678_v51, %v2323_v53  ;;  %v2291_v11 = vld [vmem:[#allocation3 + $0x228] sm:$0xf0]  ;;  %v1152_v51 = vld [vmem:[#allocation2] sm:$0x1] }
  0x86   : > { %1077 = vmatmul.bf16.vlgmr.msra.gmra.mxu0 %v3269_v60  ;;  %837 = vmatpush.bf16.msrb.mxu2 %v2174_v19  ;;  %v2294_v13 = vor.u32 %v2670_v10, %v2291_v11  ;;  %v2705_v19 = vld [vmem:[#allocation6 + $0x38] sm:$0xff]  ;;  %v1153_v55 = vsel %vm3289_vm4, 0, %v1152_v51 }
  0x87   : > { %1091 = vmatmul.bf16.vlgmr.msra.gmra.mxu1 %v3272_v61  ;;  %1317 = vmatpush.bf16.msrb.mxu0 %v2713_v18  ;;  %1154 = vst [vmem:[#allocation2] sm:$0x1] %v1153_v55  ;;  %v2737_v11 = vld [vmem:[#allocation8 + $0x78] sm:$0xff]  ;;  %v1161_v55 = vld [vmem:[%s3224_s14 + $0xc] sm:$0xf] }
  0x88   : > { %1380 = vmatpush.bf16.msrb.mxu1 %v2705_v19  ;;  %v1394_v19 = vld [vmem:[%s3224_s14] sm:$0xe] }
  0x89   : > { %850 = vmatpush.bf16.msrb.mxu3 %v2246_v17  ;;  %v2283_v17 = vld [vmem:[#allocation3 + $0x218] sm:$0xf0] }
  0x8a   : > { %838 = vmatpush.bf16.msrb.mxu2 %v2166_v27  ;;  %v2682_v27 = vld [vmem:[#allocation3 + $0x284] sm:$0xf] }
  0x8b   : > { %1318 = vmatpush.bf16.msrb.mxu0 %v2712_v23  ;;  %v2342_v30 = vor.u32 %v2682_v27, %v2339_v28  ;;  %v1413_v27 = vunpack.c.l.b16 %v1394_v19 }
  0x8d   : > { %851 = vmatpush.bf16.msrb.mxu3 %v2238_v21  ;;  %v2286_v21 = vor.u32 %v2668_v16, %v2283_v17  ;;  %v2744_v16 = vld [vmem:[#allocation8 + $0xb0] sm:$0xff]  ;;  %v1255_v17 = vpack.c.b16 %v1253_v12, %v1253_v12 }
  0x8e   : > { %839 = vmatpush.bf16.msrb.mxu2 %v2158_v35  ;;  %v2704_v35 = vld [vmem:[#allocation6 + $0x30] sm:$0xff] }
  0x8f   : > { %1319 = vmatpush.bf16.msrb.mxu0 %v2711_v34  ;;  %1381 = vmatpush.bf16.msrb.mxu1 %v2704_v35  ;;  %v1264_v26 = vshll.u32 %v1255_v17, 16  ;;  %v2743_v34 = vld [vmem:[#allocation8 + $0xa8] sm:$0xff] }
  0x91   : > { %852 = vmatpush.bf16.msrb.mxu3 %v2230_v31 }
  0x92   : > { %840 = vmatpush.bf16.msrb.mxu2 %v2150_v42  ;;  %v2709_v42 = vld [vmem:[#allocation6 + $0x58] sm:$0xff] }
  0x93   : > { %1382 = vmatpush.bf16.msrb.mxu1 %v2703_v40  ;;  %v2725_v40 = vld [vmem:[#allocation8 + $0x18] sm:$0xff] }
  0x95   : > { %853 = vmatpush.bf16.msrb.mxu3 %v2222_v36  ;;  %841 = vmatmul.bf16.vlgmr.msrb.gmra.mxu2 %v3235_v44  ;;  %v2672_v44 = vld [vmem:[#allocation3 + $0x234] sm:$0xf]  ;;  %v2710_v36 = vld [vmem:[#allocation6 + $0x60] sm:$0xff] }
  0x96   : > { %1097 = vmatpush.bf16.msra.mxu2 %v2334_v41  ;;  %1320 = vmatpush.bf16.msrb.mxu0 %v2710_v36  ;;  %v2701_v41 = vld [vmem:[#allocation6 + $0x18] sm:$0xff] }
  0x97   : > { %1383 = vmatpush.bf16.msrb.mxu1 %v2702_v43  ;;  %v2735_v43 = vld [vmem:[#allocation8 + $0x68] sm:$0xff] }
  0x99   : > { %854 = vmatpush.bf16.msrb.mxu3 %v2214_v33 }
  0x9a   : > { %1098 = vmatpush.bf16.msra.mxu2 %v2326_v56  ;;  %1321 = vmatpush.bf16.msrb.mxu0 %v2709_v42  ;;  %v2706_v56 = vld [vmem:[#allocation6 + $0x40] sm:$0xff] }
  0x9b   : > { %1384 = vmatpush.bf16.msrb.mxu1 %v2701_v41 }
  0x9c   : > { %855 = vmatmul.bf16.vlgmr.msrb.gmra.mxu3 %v3241_v49  ;;  %v2299_v49 = vld [vmem:[#allocation3 + $0x238] sm:$0xf0] }
  0x9d   : > { %1111 = vmatpush.bf16.msra.mxu3 %v2398_v52  ;;  %v2302_v7 = vor.u32 %v2672_v44, %v2299_v49  ;;  %v2700_v52 = vld [vmem:[#allocation6 + $0x10] sm:$0xff] }
  0x9e   : > { %1099 = vmatpush.bf16.msra.mxu2 %v2318_v50  ;;  %v2716_v49 = vld [vmem:[#allocation6 + $0x90] sm:$0xff] }
  0x9f   : > { %1385 = vmatpush.bf16.msrb.mxu1 %v2700_v52  ;;  %v2734_v52 = vld [vmem:[#allocation8 + $0x60] sm:$0xff] }
  0xa1   : > { %1112 = vmatpush.bf16.msra.mxu3 %v2390_v57  ;;  %v1158_v57 = vsel %vm1156_vm6, 0, %v1157_v54  ;;  %v1160_v54 = vld [vmem:[%s3224_s14 + $0x4] sm:$0xf] }
  0xa2   : > { %1100 = vmatpush.bf16.msra.mxu2 %v2310_v3  ;;  %1159 = vst [vmem:[#allocation2 + $0x8] sm:$0x1] %v1158_v57  ;;  %v3302_v3 = vld [vmem:[%s3224_s14 + $0x8] sm:$0xf] }
  0xa3   : > { %1386 = vmatpush.bf16.msrb.mxu1 %v2699_v45  ;;  %v1252_v44 = vunpack.c.l.b16 %v3302_v3  ;;  %v2741_v57 = vld [vmem:[#allocation8 + $0x98] sm:$0xff] }
  0xa4   : > { %v2733_v45 = vld [vmem:[#allocation8 + $0x58] sm:$0xff] }
  0xa5   : > { %1113 = vmatpush.bf16.msra.mxu3 %v2382_v63  ;;  %v1414_v35 = vpack.c.b16 %v1252_v44, %v1413_v27 }
  0xa6   : > { %1101 = vmatpush.bf16.msra.mxu2 %v2302_v7  ;;  %v2727_v7 = vld [vmem:[#allocation8 + $0x28] sm:$0xff] }
  0xa7   : > { %1387 = vmatpush.bf16.msrb.mxu1 %v2698_v4  ;;  %v2722_v4 = vld [vmem:[#allocation8] sm:$0xff] }
  0xa9   : > { %1114 = vmatpush.bf16.msra.mxu3 %v2374_v5  ;;  %v1251_v5 = vunpack.c.l.b16 %v3299_v2 }
  0xaa   : > { %1102 = vmatpush.bf16.msra.mxu2 %v2294_v13 }
  0xab   : > { %1738 = vmatpush.bf16.msra.mxu1 %v2745_v6 }
  0xad   : > { %1115 = vmatpush.bf16.msra.mxu3 %v2366_v9  ;;  %v1254_v9 = vpack.c.b16 %v1252_v44, %v1251_v5  ;;  %v2732_v44 = vld [vmem:[#allocation8 + $0x50] sm:$0xff] }
  0xae   : > { %1103 = vmatpush.bf16.msra.mxu2 %v2286_v21 }
  0xaf   : > { %v1259_v13 = vshll.u32 %v1254_v9, 16  ;;  %v1257_v22 = vshrl.u32 %v1254_v9, 16  ;;  %1388 = vmatmul.bf16.vlgmr.msrb.gmra.mxu1 %v1254_v9  ;;  %v2739_v9 = vld [vmem:[#allocation8 + $0x88] sm:$0xff] }
  0xb0   : > { %1739 = vmatpush.bf16.msra.mxu1 %v2744_v16 }
  0xb1   : > { %1116 = vmatpush.bf16.msra.mxu3 %v2358_v15  ;;  %v2715_v15 = vld [vmem:[#allocation6 + $0x88] sm:$0xff]  ;;  %v1261_v23 = vrot.slane %v1259_v13, 1 }
  0xb2   : > { %1104 = vmatpush.bf16.msra.mxu2 %v2278_v29 }
  0xb3   : > { %v1262_v29 = vor.u32 %v1261_v23, %v1257_v22 }
  0xb4   : > { %1740 = vmatpush.bf16.msra.mxu1 %v2743_v34 }
  0xb5   : > { %1117 = vmatpush.bf16.msra.mxu3 %v2350_v24  ;;  %1105 = vmatmul.bf16.vlgmr.msra.gmra.mxu2 %v3269_v60  ;;  %v2708_v60 = vld [vmem:[#allocation6 + $0x50] sm:$0xff] }
  0xb6   : > { %1467 = vmatpush.bf16.msrb.mxu2 %v2721_v38  ;;  %1322 = vmatpush.bf16.msrb.mxu0 %v2708_v60  ;;  %v1415_v60 = vrot.slane %v1414_v35, 1  ;;  %v1209_v35 = vld [vmem:[#allocation2 + $0x8] sm:$0x1] }
  0xb9   : > { %1118 = vmatpush.bf16.msra.mxu3 %v2342_v30 }
  0xba   : > { %1468 = vmatpush.bf16.msrb.mxu2 %v2720_v46  ;;  %1323 = vmatpush.bf16.msrb.mxu0 %v2707_v47  ;;  %v1416_v46 = vrot.slane %v1255_v17, 1  ;;  %v2724_v47 = vld [vmem:[#allocation8 + $0x10] sm:$0xff]  ;;  %v2730_v17 = vld [vmem:[#allocation8 + $0x40] sm:$0xff] }
  0xbc   : > { %1119 = vmatmul.bf16.vlgmr.msra.gmra.mxu3 %v3272_v61 }
  0xbd   : > { %1588 = vmatpush.bf16.msrb.mxu3 %v2737_v11 }
  0xbe   : > { %1469 = vmatpush.bf16.msrb.mxu2 %v2719_v48  ;;  %1324 = vmatpush.bf16.msrb.mxu0 %v2706_v56 }
  0xc1   : > { %1589 = vmatpush.bf16.msrb.mxu3 %v2736_v25 }
  0xc2   : > { %1470 = vmatpush.bf16.msrb.mxu2 %v2718_v58  ;;  %1651 = vmatpush.bf16.msra.mxu0 %v2729_v59  ;;  %v2723_v58 = vld [vmem:[#allocation8 + $0x8] sm:$0xff] }
  0xc3   : > { %v596_v31 = vpop.f32.mrf.mxu0 }
  0xc4   : > { %v610_v32 = vpop.f32.mrf.mxu1 }
  0xc5   : > { %v611_v1 = vadd.f32 %v610_v32, %v596_v31  ;;  %v1266_v31 = vrot.slane %v1264_v26, 1  ;;  %v2714_v32 = vld [vmem:[#allocation6 + $0x80] sm:$0xff]  ;;  %1590 = vmatpush.bf16.msrb.mxu3 %v2735_v43  ;;  %v1205_v26 = vld [vmem:[#allocation2] sm:$0xf] }
  0xc6   : > { %1471 = vmatpush.bf16.msrb.mxu2 %v2717_v62  ;;  %1652 = vmatpush.bf16.msra.mxu0 %v2728_v0  ;;  %v1163_v62 = vunpack.c.l.bf16 %v1160_v54 }
  0xc7   : > { %v1267_v38 = vsel %vm400_vm0, %v1262_v29, %v1266_v31 }
  0xc8   : > { %1325 = vmatmul.bf16.vlgmr.msrb.gmra.mxu0 %v1267_v38 }
  0xc9   : > { %1591 = vmatpush.bf16.msrb.mxu3 %v2734_v52 }
  0xca   : > { %1472 = vmatpush.bf16.msrb.mxu2 %v2716_v49  ;;  %1653 = vmatpush.bf16.msra.mxu0 %v2727_v7  ;;  %v1170_v49 = vrot.slane %v1163_v62, 1  ;;  %v1162_v7 = vld [vmem:[%s3224_s14 + $0x14] sm:$0x1]  ;;  %s2973_s14 = scalar_lea.hbm %s3431_s5, 32 }
  0xcb   : > { %v3282_v37 = vpop.f32.mrf.mxu0  ;;  %v1165_v12 = vunpack.c.l.bf16 %v1162_v7  ;;  %p2975_p4 = scmp.lt.s32.totalorder %s2973_s14, %s2969_s26 }
  0xcc   : > { %v3284_v39 = vpop.f32.mrf.mxu1 }
  0xcd   : > { %v613_v28 = vadd.f32 %v3284_v39, %v3282_v37  ;;  %1592 = vmatpush.bf16.msrb.mxu3 %v2733_v45  ;;  %p2976_p7 = por %p2975_p4, %p2974_p3 }
  0xce   : > { %1473 = vmatpush.bf16.msrb.mxu2 %v2715_v15  ;;  %1654 = vmatpush.bf16.msra.mxu0 %v2726_v20  ;;  %v1173_v20 = vrot.slane %v1165_v12, 1 }
  0xcf   : > { %p2977_p8 = pnand %p2976_p7, %p2972_p2 }
  0xd1   : > { %1593 = vmatpush.bf16.msrb.mxu3 %v2732_v44 }
  0xd2   : > { %1474 = vmatpush.bf16.msrb.mxu2 %v2714_v32  ;;  %1655 = vmatpush.bf16.msra.mxu0 %v2725_v40 }
  0xd6   : > { %1656 = vmatpush.bf16.msra.mxu0 %v2724_v47 }
  0xda   : > { %1657 = vmatpush.bf16.msra.mxu0 %v2723_v58 }
  0xde   : > { %1658 = vmatpush.bf16.msra.mxu0 %v2722_v4 }
  0xe3   : > { %v814_v61 = vpop.f32.mrf.mxu0 }
  0xe4   : > { %v3286_v33 = vpop.f32.mrf.mxu1  ;;  %v815_v10 = vadd.f32 %v814_v61, %v611_v1  ;;  %v1417_v61 = vsel %vm900_vm1, %v1415_v60, %v1416_v46 }
  0xe5   : > { %1475 = vmatmul.bf16.vlgmr.msrb.gmra.mxu2 %v1417_v61 }
  0xe6   : > { %v829_v21 = vadd.f32 %v3286_v33, %v815_v10  ;;  %v2742_v33 = vld [vmem:[#allocation8 + $0xa0] sm:$0xff]  ;;  %v2731_v10 = vld [vmem:[#allocation8 + $0x48] sm:$0xff] }
  0xe7   : > { %1741 = vmatpush.bf16.msra.mxu1 %v2742_v33  ;;  %1594 = vmatpush.bf16.msrb.mxu3 %v2731_v10 }
  0xeb   : > { %v816_v50 = vpop.f32.mrf.mxu0  ;;  %1742 = vmatpush.bf16.msra.mxu1 %v2741_v57  ;;  %1595 = vmatpush.bf16.msrb.mxu3 %v2730_v17 }
  0xec   : > { %v3296_v63 = vpop.f32.mrf.mxu1  ;;  %v817_v36 = vadd.f32 %v816_v50, %v613_v28  ;;  %v2740_v50 = vld [vmem:[#allocation8 + $0x90] sm:$0xff] }
  0xee   : > { %v831_v48 = vadd.f32 %v3296_v63, %v817_v36  ;;  %v1164_v63 = vunpack.c.l.bf16 %v1161_v55 }
  0xef   : > { %1743 = vmatpush.bf16.msra.mxu1 %v2740_v50 }
  0xf0   : > { %v1171_v6 = vrot.slane %v1164_v63, 1 }
  0xf2   : > { %v1172_v11 = vsel %vm900_vm1, %v1170_v49, %v1171_v6  ;;  %v1174_v19 = vsel %vm900_vm1, %v1171_v6, %v1173_v20 }
  0xf3   : > { %1744 = vmatpush.bf16.msra.mxu1 %v2739_v9 }
  0xff   : > { %v638_v53 = vpop.f32.mrf.mxu3 }
 0x103   : > { %v1078_v14 = vpop.f32.mrf.mxu0 }
 0x104   : > { %v1092_v18 = vpop.f32.mrf.mxu1 }
 0x105   : > { %v1093_v24 = vadd.f32 %v1092_v18, %v1078_v14  ;;  %v2738_v14 = vld [vmem:[#allocation8 + $0x80] sm:$0xff] }
 0x106   : > { %1745 = vmatpush.bf16.msra.mxu1 %v2738_v14 }
 0x107   : > { %v1125_v30 = vadd.f32 %v1093_v24, %v829_v21  ;;  %v640_v62 = vpop.f32.mrf.mxu3 }
 0x109   : > { %v1129_v42 = vsub.f32 0.0, %v1125_v30 }
 0x10b   : > { %v1131_v37 = vmul.f32 1.442695, %v1129_v42  ;;  %v1080_v39 = vpop.f32.mrf.mxu0 }
 0x10c   : > { %v1094_v41 = vpop.f32.mrf.mxu1 }
 0x10d   : > { %2843 = vpow2.f32 %v1131_v37  ;;  %v1095_v51 = vadd.f32 %v1094_v41, %v1080_v39 }
 0x10f   : > { %v1127_v56 = vadd.f32 %v1095_v51, %v831_v48  ;;  %v624_v51 = vpop.f32.mrf.mxu2 }
 0x111   : > { %v1130_v59 = vsub.f32 0.0, %v1127_v56 }
 0x113   : > { %v2844_v0 = vpop.eup %2843  ;;  %v1133_v1 = vmul.f32 1.442695, %v1130_v59 }
 0x114   : > { %v1135_v5 = vadd.f32 1.0, %v2844_v0 }
 0x115   : > { %2845 = vpow2.f32 %v1133_v1 }
 0x116   : > { %2847 = vrcp.f32 %v1135_v5  ;;  %v639_v5 = vadd.f32 %v638_v53, %v624_v51 }
 0x117   : > { %v626_v50 = vpop.f32.mrf.mxu2 }
 0x11b   : > { %v2846_v13 = vpop.eup %2845 }
 0x11c   : > { %v2848_v15 = vpop.eup %2847  ;;  %v1136_v16 = vadd.f32 1.0, %v2846_v13 }
 0x11d   : > { %v1177_v18 = vmul.f32 %v2848_v15, %v1172_v11  ;;  %1781 = vst [vmem:[%s3327_s19] sm:$0xff] %v2848_v15 }
 0x11e   : > { %2849 = vrcp.f32 %v1136_v16 }
 0x11f   : > { %v1179_v22 = vpack.c.bf16 %v1177_v18, %v1177_v18  ;;  %v842_v63 = vpop.f32.mrf.mxu2  ;;  %v856_v0 = vpop.f32.mrf.mxu3 }
 0x120   : > { %v843_v44 = vadd.f32 %v842_v63, %v639_v5 }
 0x121   : > { %v1184_v23 = vshrl.u32 %v1179_v22, 16  ;;  %v1187_v24 = vshll.u32 %v1179_v22, 16 }
 0x123   : > { %v1186_v21 = vrot.slane %v1184_v23, 7 }
 0x124   : > { %v2850_v25 = vpop.eup %2849 }
 0x125   : > { %v1189_v27 = vor.u32 %v1187_v24, %v1186_v21  ;;  %v1178_v28 = vmul.f32 %v2850_v25, %v1174_v19  ;;  %1782 = vst [vmem:[%s3327_s19 + $0x8] sm:$0xff] %v2850_v25  ;;  %v1190_v36 = vrot.slane %v1186_v21, 4 }
 0x127   : > { %v1206_v29 = vsel %vm1204_vm8, %v1189_v27, %v1205_v26  ;;  %v1180_v30 = vpack.c.bf16 %v1178_v28, %v1178_v28  ;;  %v844_v1 = vpop.f32.mrf.mxu2  ;;  %v858_v4 = vpop.f32.mrf.mxu3 }
 0x128   : > { %1207 = vst [vmem:[#allocation2] sm:$0xf] %v1206_v29 }
 0x129   : > { %v1192_v31 = vshrl.u32 %v1180_v30, 16  ;;  %v1195_v34 = vshll.u32 %v1180_v30, 16 }
 0x12b   : > { %v1194_v32 = vrot.slane %v1192_v31, 7 }
 0x12d   : > { %v1197_v40 = vor.u32 %v1195_v34, %v1194_v32  ;;  %v1199_v42 = vrot.slane %v1194_v32, 4 }
 0x12f   : > { %v1198_v38 = vsel %vm1182_vm10, %v1190_v36, %v1197_v40  ;;  %v1210_v43 = vsel %vm3289_vm4, %v1199_v42, %v1209_v35  ;;  %v2754_v61 = vld [vmem:[#allocation2] sm:$0xe] }
 0x130   : > { %1208 = vst [vmem:[#allocation2 + $0x4] sm:$0xf] %v1198_v38 }
 0x131   : > { %1211 = vst [vmem:[#allocation2 + $0x8] sm:$0x1] %v1210_v43 }
 0x137   : > { %v2750_v60 = vld [vmem:[#allocation2] sm:$0xff]  }
 0x138   : > { %v2753_v46 = vld [vmem:[#allocation2] sm:$0xf0]  ;;  %v1530_v37 = vshll.u32 %v2750_v60, 16  ;;  %1659 = vmatmul.bf16.vlgmr.msra.gmra.mxu0 %v2750_v60  ;;  %v1501_v39 = vld [vmem:[#allocation2 + $0x8] sm:$0x1]  ;;  %v1528_v52 = vshrl.u32 %v2750_v60, 16 }
 0x139   : > { %v1524_v33 = vunpack.c.l.b16 %v1501_v39  ;;  %v2755_v41 = vor.u32 %v2754_v61, %v2753_v46 }
 0x13a   : > { %v1532_v47 = vrot.slane %v1530_v37, 1 }
 0x13b   : > { %v1526_v48 = vpack.c.b16 %v1524_v33, %v1524_v33  ;;  %v1686_v54 = vrot.slane %v2755_v41, 1 }
 0x13c   : > { %v1533_v57 = vor.u32 %v1532_v47, %v1528_v52 }
 0x13d   : > { %v1687_v55 = vrot.slane %v1526_v48, 1  ;;  %v1535_v56 = vshll.u32 %v1526_v48, 16 }
 0x13f   : > { %v1688_v58 = vsel %vm900_vm1, %v1686_v54, %v1687_v55  ;;  %v1537_v59 = vrot.slane %v1535_v56, 1 }
 0x140   : > { %1746 = vmatmul.bf16.vlgmr.msra.gmra.mxu1 %v1688_v58 }
 0x141   : > { %v1538_v45 = vsel %vm400_vm0, %v1533_v57, %v1537_v59 }
 0x142   : > { %1596 = vmatmul.bf16.vlgmr.msrb.gmra.mxu3 %v1538_v45 }
 0x143   : > { %2980 = shalt.err (!%p2977_p8)
}
 0x144   : > { %s3092_s19 = smov 128   ;;  %s3093_s29 = smov 8   ;;  %v641_v49 = vadd.f32 %v640_v62, %v626_v50  ;;  %v857_v6 = vadd.f32 %v856_v0, %v843_v44  ;;  %v1106_v7 = vpop.f32.mrf.mxu2  ;;  %v1120_v9 = vpop.f32.mrf.mxu3  ;;  %v1758_v26 = vunpack.c.l.bf16 %v3299_v2  ;;  %v1759_v27 = vunpack.c.l.bf16 %v3302_v3 }
 0x145   : > { %2770 = dma.vmem_to_hbm [thread:$0]  (%p3169_p5), %s1826_s13, 256, %s1828_s16, %s3347_s17, %s3092_s19, %s3092_s19, %s3093_s29   ;;  %v1121_v10 = vadd.f32 %v1120_v9, %v1106_v7  ;;  %v1760_v28 = vunpack.c.l.bf16 %v3307_v8 }
 0x146   : > { %v845_v11 = vadd.f32 %v844_v1, %v641_v49  ;;  %s312_s10 = scalar_lea.vmem [#allocation12], %s3323_s18  ;;  %s1841_s16 = scalar_lea.hbm %s3432_s6, %s3339_s20  ;;  %v1764_v30 = vrot.slane %v1758_v26, 1  ;;  %v1765_v31 = vrot.slane %v1759_v27, 1 }
 0x147   : > { %v1126_v12 = vadd.f32 %v1121_v10, %v857_v6  ;;  %v1767_v32 = vrot.slane %v1760_v28, 1  ;;  %s1842_s1 = sshll.u32 %s312_s10, 4  ;;  %s1844_s26 = sshll.u32 %s1841_s16, 4  ;;  %s1843_s1 = int_to_ptr.vmem [resolvable:$true] %s1842_s1  ;;  %s1845_s26 = int_to_ptr.hbm [resolvable:$true] %s1844_s26 }
 0x148   : > { %v859_v14 = vadd.f32 %v858_v4, %v845_v11  ;;  %v1766_v3 = vsel %vm900_vm1, %v1764_v30, %v1765_v31  ;;  %s2995_s9 = sshra.s32 %s1845_s26, 4  ;;  %s3001_s25 = scalar_lea.hbm %s3432_s6, 32  ;;  %s2996_s9 = int_to_ptr.hbm [resolvable:$true] %s2995_s9 }
 0x149   : > { %v1139_v13 = vsub.f32 0.0, %v1126_v12  ;;  %v1768_v8 = vsel %vm900_vm1, %v1765_v31, %v1767_v32  ;;  %s2997_s12 = scalar_lea.hbm %s2996_s9, 16  ;;  %p3002_p12 = scmp.lt.s32.totalorder %s2996_s9, %s3432_s6 }
 0x14a   : > { %p2998_p9 = scmp.ne.s32.totalorder %s2996_s9, %s2997_s12  ;;  %p3003_p13 = scmp.lt.s32.totalorder %s3001_s25, %s2997_s12 }
 0x14b   : > { %v1141_v15 = vmul.f32 1.442695, %v1139_v13 }
 0x14c   : > { %v1108_v16 = vpop.f32.mrf.mxu2  ;;  %v1122_v17 = vpop.f32.mrf.mxu3  ;;  %p2999_p10 = pnand %p2998_p9, %p3169_p5  ;;  %p3004_p0 = por %p3003_p13, %p3002_p12 }
 0x14d   : > { %2851 = vpow2.f32 %v1141_v15  ;;  %v1123_v18 = vadd.f32 %v1122_v17, %v1108_v16 }
 0x14e   : > { %p3000_p11 = pneg %p2999_p10 }
 0x14f   : > { %v1128_v20 = vadd.f32 %v1123_v18, %v859_v14 }
 0x150   : > { %p3005_p1 = pnand %p3004_p0, %p3000_p11 }
 0x151   : > { %v1140_v22 = vsub.f32 0.0, %v1128_v20 }
 0x153   : > { %v2852_v23 = vpop.eup %2851  ;;  %v1143_v19 = vmul.f32 1.442695, %v1140_v22 }
 0x154   : > { %v1145_v21 = vadd.f32 1.0, %v2852_v23 }
 0x155   : > { %2853 = vpow2.f32 %v1143_v19 }
 0x156   : > { %2855 = vrcp.f32 %v1145_v21 }
 0x15b   : > { %v2854_v24 = vpop.eup %2853 }
 0x15c   : > { %v2856_v25 = vpop.eup %2855  ;;  %v1146_v29 = vadd.f32 1.0, %v2854_v24 }
 0x15d   : > { %1783 = vst [vmem:[%s312_s10] sm:$0xff] %v2856_v25  ;;  %v1771_v34 = vmul.f32 %v2856_v25, %v1766_v3 }
 0x15e   : > { %2857 = vrcp.f32 %v1146_v29 }
 0x164   : > { %v2858_v2 = vpop.eup %2857 }
 0x165   : > { %v1772_v35 = vmul.f32 %v2858_v2, %v1768_v8  ;;  %1784 = vst [vmem:[%s312_s10 + $0x8] sm:$0xff] %v2858_v2 }
 0x166   : > { %3008 = shalt.err (!%p3005_p1)
}
 0x167   : > { %2771 = dma.vmem_to_hbm [thread:$0]  (%p3169_p5), %s1843_s1, 256, %s1845_s26, %s3347_s17, %s3092_s19, %s3092_s19, %s3093_s29   ;;  %v1326_v36 = vpop.f32.mrf.mxu0  ;;  %v1389_v40 = vpop.f32.mrf.mxu1  ;;  %v1773_v58 = vsub.f32 1.0, %v2856_v25  ;;  %v1774_v63 = vsub.f32 1.0, %v2858_v2 }
 0x168   : > { %v1476_v43 = vpop.f32.mrf.mxu2  ;;  %v1390_v46 = vadd.f32 %v1389_v40, %v1326_v36  ;;  %s298_s17 = scalar_lea.vmem [#allocation9], %s3323_s18  ;;  %s1807_s1 = scalar_lea.hbm %s3430_s4, %s3339_s20 }
 0x169   : > { %s1808_s26 = sshll.u32 %s298_s17, 4  ;;  %s1810_s9 = sshll.u32 %s1807_s1, 4  ;;  %s1809_s26 = int_to_ptr.vmem [resolvable:$true] %s1808_s26  ;;  %s1811_s9 = int_to_ptr.hbm [resolvable:$true] %s1810_s9 }
 0x16a   : > { %v1481_v33 = vadd.f32 %v1476_v43, %v1390_v46  ;;  %s1786_s12 = scalar_lea.sflag [#allocation5], %s296_s15  ;;  %s3023_s14 = sshra.s32 %s1811_s9, 4  ;;  %s3024_s14 = int_to_ptr.hbm [resolvable:$true] %s3023_s14 }
 0x16b   : > { %s3025_s18 = scalar_lea.hbm %s3024_s14, 16  ;;  %s3029_s25 = scalar_lea.hbm %s3430_s4, 32 }
 0x16c   : > { %p3026_p2 = scmp.ne.s32.totalorder %s3024_s14, %s3025_s18  ;;  %p3030_p7 = scmp.lt.s32.totalorder %s3024_s14, %s3430_s4 }
 0x16d   : > { %p3031_p8 = scmp.lt.s32.totalorder %s3029_s25, %s3025_s18 }
 0x16e   : > { %p3027_p3 = pnand %p3026_p2, %p3169_p5 }
 0x16f   : > { %v1328_v42 = vpop.f32.mrf.mxu0  ;;  %v1391_v38 = vpop.f32.mrf.mxu1  ;;  %p3032_p9 = por %p3031_p8, %p3030_p7 }
 0x170   : > { %v1392_v48 = vadd.f32 %v1391_v38, %v1328_v42  ;;  %v1478_v51 = vpop.f32.mrf.mxu2  ;;  %p3028_p4 = pneg %p3027_p3 }
 0x172   : > { %v1482_v53 = vadd.f32 %v1478_v51, %v1392_v48  ;;  %p3033_p10 = pnand %p3032_p9, %p3028_p4 }
 0x1b5   : > { %v1660_v60 = vpop.f32.mrf.mxu0 }
 0x1bd   : > { %v1747_v37 = vpop.f32.mrf.mxu1  ;;  %v1662_v52 = vpop.f32.mrf.mxu0 }
 0x1c5   : > { %v1597_v39 = vpop.f32.mrf.mxu3  ;;  %v1749_v56 = vpop.f32.mrf.mxu1 }
 0x1c6   : > { %v1661_v61 = vadd.f32 %v1660_v60, %v1597_v39 }
 0x1c8   : > { %v1752_v41 = vadd.f32 %v1747_v37, %v1661_v61 }
 0x1ca   : > { %v1754_v47 = vadd.f32 %v1752_v41, %v1481_v33 }
 0x1cc   : > { %2859 = vtanh.f32 %v1754_v47 }
 0x1cd   : > { %v1599_v54 = vpop.f32.mrf.mxu3 }
 0x1ce   : > { %v1663_v55 = vadd.f32 %v1662_v52, %v1599_v54 }
 0x1d0   : > { %v1753_v57 = vadd.f32 %v1749_v56, %v1663_v55 }
 0x1d2   : > { %v2860_v59 = vpop.eup %2859  ;;  %v1755_v45 = vadd.f32 %v1753_v57, %v1482_v53 }
 0x1d3   : > { %v1775_v50 = vmul.f32 %v2860_v59, %v1773_v58 }
 0x1d4   : > { %2861 = vtanh.f32 %v1755_v45 }
 0x1d5   : > { %v1777_v62 = vadd.f32 %v1775_v50, %v1771_v34 }
 0x1d7   : > { %1779 = vst [vmem:[%s298_s17] sm:$0xff] %v1777_v62 }
 0x1da   : > { %v2862_v0 = vpop.eup %2861 }
 0x1db   : > { %v1776_v1 = vmul.f32 %v2862_v0, %v1774_v63 }
 0x1dd   : > { %v1778_v4 = vadd.f32 %v1776_v1, %v1772_v35 }
 0x1df   : > { %1780 = vst [vmem:[%s298_s17 + $0x8] sm:$0xff] %v1778_v4 }
 0x1e0   : > { %3036 = shalt.err (!%p3033_p10)
}
 0x1e1   : > { %2769 = dma.vmem_to_hbm [thread:$0]  (%p3169_p5), %s1809_s26, 256, %s1811_s9, %s1786_s12, %s3092_s19, %s3092_s19, %s3093_s29  }
 0x1e2 PF: > { %p2801_p11 = scmp.ge.s32.totalorder %s3083_s24, 2  ;;  %s1859_s15 = sand.u32 1, %s3071_s21  }
 0x1e3   : > { %s1860_s17 = scalar_lea.sflag [#allocation5], %s1859_s15 }
 0x1e4   : > { %p2786_p12 = pnand %p2801_p11, %p3173_p6 }
 0x1e6   : > { %p2787_p13 = pneg %p2786_p12 }
 0x1e8   : > { %3062 = dma.done.wait (%p2787_p13), %s1860_s17, 256  }
 0x1e9   : > { %3064 = vsyncadd (%p2787_p13), %s1860_s17, 4294967040  ;;  %s3442_s10 = sadd.s32 4294967294, %s3083_s24  }
 0x1ea   : > { %s1869_s16 = sand.u32 1, %s3442_s10  }
 0x1eb   : > { %s1870_s7 = scalar_lea.sflag [#allocation11], %s1869_s16 }
 0x1ec   : > { %3066 = dma.done.wait (%p2787_p13), %s1870_s7, 512  }
 0x1ed   : > { %3068 = vsyncadd (%p2787_p13), %s1870_s7, 4294966784  ;;  %p22_p5 = scmp.ge.s32.totalorder %s3154_s27, 4   ;;  %s3443_s21 = smov %s3075_s22 }
 0x1ee   : > { %s3444_s22 = smov %s3079_s23  ;;  %s3445_s23 = smov %s3167_s30 }
 0x1ef   : > { %s3446_s24 = smov %s3154_s27  ;;  %24 = sbr.rel (!%p22_p5) target bundleno = 9 (0x9), region = 122 }
 0x1f4   :  { %1886 = vsyncpa [#allocation4], 1 }
 0x1f5   :  { %1888 = vsyncpa [#allocation4 + $0x1], 1 }
 0x1f6   :  { %1889 = vsyncpa [#allocation7], 1 }
 0x1f7   :  { %1890 = vsyncpa [#allocation5], 1 }
 0x1f8   :  { %1892 = vsyncpa [#allocation5 + $0x1], 1 }
 0x1f9   :  { %1893 = vsyncpa [#allocation11], 1 }
 0x1fa   :  { %1895 = vsyncpa [#allocation11 + $0x1], 1 }

</bundles_post_ra>
